<compile_context>
chip_gen: v7x
topology: tpu7x:2x2x1
jax: 0.10.0
libtpu: 0.0.40
codegen_flags: <defaults>
</compile_context>

<pallas_src>
import functools
import math

import jax
import jax.numpy as jnp
from jax import lax
from jax.experimental import pallas as pl
from jax.experimental.pallas import tpu as pltpu

LANE = 128      # f32 vreg lane count
SUBLANE = 8     # f32 vreg sublane count
NEG_BIG = -1e30 # softmax mask value for padded alpha lanes (exp underflows to 0)


def ran_kernel(x_ref, h0_ref, wi3_ref, wh3_ref, whead_ref,
               alpha_ref, sigma_ref, hn_ref, *, T, B, HIST, ALANE):
    """Whole forward pass (GRU recurrence + heads) for one small problem.

    x_ref     : (T*B, F)              time-major rows (B sublane-padded)
    h0_ref    : (B, HP)               hidden state, lane-padded H -> HP (=128)
    wi3_ref   : (F, 3*HP)             gate g (r,z,n) in lanes [g*HP, g*HP+H)
    wh3_ref   : (HP, 3*HP)            same lane-group layout, rows H..HP zero
    whead_ref : (HP, ALANE + SLANE)   [W_alpha^T | W_sigma^T], lane-padded heads
    alpha_ref : (T*B, ALANE)          lane-dense alpha slab (real cols [0, HIST))
    sigma_ref : (T*B, SLANE)          lane-dense sigma slab (real cols [0, F))
    hn_ref    : (B, HP)               final hidden state
    """
    HP = h0_ref.shape[1]

    # (1) Input-side gate projections hoisted out of the recurrence:
    #     one (T*B, F) @ (F, 3*HP) matmul. Kept as an SSA value (no scratch).
    xg = jnp.dot(x_ref[...], wi3_ref[...],
                 preferred_element_type=jnp.float32)            # (T*B, 3*HP)

    wh3 = wh3_ref[...]
    h = h0_ref[...]                                             # (B, HP)

    # (2) Recurrence: fully unrolled static Python loop — only the irreducible
    #     dependency chain remains: one fused (B,HP)@(HP,3*HP) MXU op plus one
    #     vreg of full-lane-group VPU/EUP gate math per step.
    # TODO(synk): hold wh3 resident in MXU weight-staging registers across the
    # loop via pltpu.matmul_push_rhs / matmul_acc_lhs / matmul_pop once the
    # lowering constraints for this (8, 128)x(128, 384) f32 shape are confirmed.
    hs = []
    for t in range(T):
        xg_t = xg[t * B:(t + 1) * B, :]          # static, sublane-aligned slice
        hg = jnp.dot(h, wh3, preferred_element_type=jnp.float32)   # (B, 3*HP)

        # PyTorch GRU semantics (bias=False, gate order r, z, n).
        # Each gate occupies a full 128-lane group -> whole-vreg slices.
        r = jax.nn.sigmoid(xg_t[:, 0:HP] + hg[:, 0:HP])
        z = jax.nn.sigmoid(xg_t[:, HP:2 * HP] + hg[:, HP:2 * HP])
        n = jnp.tanh(xg_t[:, 2 * HP:3 * HP] + r * hg[:, 2 * HP:3 * HP])
        h = (1.0 - z) * n + z * h
        hs.append(h)

    hn_ref[...] = h

    # (3) alpha / sigma heads hoisted out of the recurrence: one matmul over all
    #     timesteps, lane-dense result, split at a 128-lane group boundary.
    hbuf = jnp.concatenate(hs, axis=0)                          # (T*B, HP)
    head = jnp.dot(hbuf, whead_ref[...],
                   preferred_element_type=jnp.float32)          # (T*B, ALANE+SLANE)

    logits = head[:, :ALANE]
    lane = lax.broadcasted_iota(jnp.int32, logits.shape, 1)
    logits = jnp.where(lane < HIST, logits, NEG_BIG)   # mask padded alpha lanes
    m = jnp.max(logits, axis=-1, keepdims=True)
    e = jnp.exp(logits - m)
    # Exact division: the head runs once (outside the serial loop), so an
    # approximate EUP reciprocal buys nothing and exactness keeps 1e-4 tolerance.
    alpha_ref[...] = e / jnp.sum(e, axis=-1, keepdims=True)
    sigma_ref[...] = jnp.exp(head[:, ALANE:])


def _round_up(x, m):
    return ((x + m - 1) // m) * m


def ran_forward(x, hidden, params):
    """x: (T, B, F) f32, hidden: (1, B, H) f32, params: dict of weights."""
    T, B, F = x.shape
    H = hidden.shape[-1]
    HIST = params["w_alpha"].shape[0]

    B_pad = _round_up(max(B, SUBLANE), SUBLANE)   # sublane-dense batch rows
    HP = _round_up(H, LANE)                       # each gate = full lane group(s)
    ALANE = _round_up(HIST, LANE)                 # lane-dense alpha head
    SLANE = _round_up(F, LANE)                    # lane-dense sigma head

    h0 = hidden[0]
    if B_pad != B:
        x = jnp.pad(x, ((0, 0), (0, B_pad - B), (0, 0)))
        h0 = jnp.pad(h0, ((0, B_pad - B), (0, 0)))
    if HP != H:
        h0 = jnp.pad(h0, ((0, 0), (0, HP - H)))
    x2d = x.reshape(T * B_pad, F)

    # Fuse / pre-transpose / lane-align weights once, outside the kernel.
    w_ih, w_hh = params["w_ih"], params["w_hh"]
    wi3 = jnp.zeros((F, 3 * HP), jnp.float32)
    wh3 = jnp.zeros((HP, 3 * HP), jnp.float32)
    for g in range(3):  # gate order: r, z, n
        wi3 = wi3.at[:, g * HP:g * HP + H].set(w_ih[g * H:(g + 1) * H, :].T)
        wh3 = wh3.at[:H, g * HP:g * HP + H].set(w_hh[g * H:(g + 1) * H, :].T)
    whead = jnp.zeros((HP, ALANE + SLANE), jnp.float32)
    whead = whead.at[:H, :HIST].set(params["w_alpha"].T)
    whead = whead.at[:H, ALANE:ALANE + F].set(params["w_sigma"].T)

    kernel = functools.partial(ran_kernel, T=T, B=B_pad, HIST=HIST, ALANE=ALANE)

    # TODO(synk): for large T*B, add a "parallel" batch-tile grid axis (engages
    # v7x's second TensorCore) plus a T-chunk "arbitrary" axis with h carried in
    # scratch; size the chunk against v7x's 64 MiB VMEM (32 MiB scoped default)
    # and set vmem_limit_bytes explicitly (v5e scoped default is only 16 MiB).
    vmem = pl.BlockSpec(memory_space=pltpu.MemorySpace.VMEM)
    alpha2d, sigma2d, hn = pl.pallas_call(
        kernel,
        out_shape=(
            jax.ShapeDtypeStruct((T * B_pad, ALANE), jnp.float32),
            jax.ShapeDtypeStruct((T * B_pad, SLANE), jnp.float32),
            jax.ShapeDtypeStruct((B_pad, HP), jnp.float32),
        ),
        in_specs=[vmem] * 5,
        out_specs=(vmem, vmem, vmem),
    )(x2d, h0, wi3, wh3, whead)

    alpha = alpha2d.reshape(T, B_pad, ALANE)[:, :B, :HIST]
    sigma = sigma2d.reshape(T, B_pad, SLANE)[:, :B, :F]
    return alpha, sigma, hn[None, :B, :H]


def ran_reference(x, hidden, params):
    """Pure-JAX reference mirroring the PyTorch module (for validation)."""
    H = hidden.shape[-1]
    w_ih, w_hh = params["w_ih"], params["w_hh"]
    wir, wiz, win = w_ih[0:H], w_ih[H:2 * H], w_ih[2 * H:3 * H]
    whr, whz, whn = w_hh[0:H], w_hh[H:2 * H], w_hh[2 * H:3 * H]

    def cell(h, x_t):
        r = jax.nn.sigmoid(x_t @ wir.T + h @ whr.T)
        z = jax.nn.sigmoid(x_t @ wiz.T + h @ whz.T)
        n = jnp.tanh(x_t @ win.T + r * (h @ whn.T))
        h_new = (1.0 - z) * n + z * h
        return h_new, h_new

    h_last, outs = lax.scan(cell, hidden[0], x)
    alpha = jax.nn.softmax(outs @ params["w_alpha"].T, axis=-1)
    sigma = jnp.exp(outs @ params["w_sigma"].T)
    return alpha, sigma, h_last[None, :, :]


def init_params(key, input_size, hidden_size, history_size):
    """Deterministic parameter init matching the module's shapes."""
    k1, k2, k3, k4 = jax.random.split(key, 4)
    stdv = 1.0 / math.sqrt(hidden_size)  # torch.nn.GRU default init
    w_ih = jax.random.uniform(k1, (3 * hidden_size, input_size),
                              minval=-stdv, maxval=stdv, dtype=jnp.float32)
    w_hh = jax.random.uniform(k2, (3 * hidden_size, hidden_size),
                              minval=-stdv, maxval=stdv, dtype=jnp.float32)

    def xavier(k, shape):
        fan_out, fan_in = shape
        a = math.sqrt(6.0 / (fan_in + fan_out))
        return jax.random.uniform(k, shape, minval=-a, maxval=a, dtype=jnp.float32)

    w_alpha = xavier(k3, (history_size, hidden_size))
    w_sigma = xavier(k4, (input_size, hidden_size))
    return {"w_ih": w_ih, "w_hh": w_hh, "w_alpha": w_alpha, "w_sigma": w_sigma}


if __name__ == "__main__":
    T, B, F = 8, 4, 4          # seq len, batch, feature size
    HIDDEN, HIST = 32, 8       # hidden size, history size

    key = jax.random.PRNGKey(0)
    kx, kh, kp = jax.random.split(key, 3)
    x = jax.random.normal(kx, (T, B, F), dtype=jnp.float32)
    hidden = jnp.zeros((1, B, HIDDEN), dtype=jnp.float32)  # RAN.init_hidden
    params = init_params(kp, F, HIDDEN, HIST)

    alpha, sigma, h_n = ran_forward(x, hidden, params)
    jax.block_until_ready((alpha, sigma, h_n))

    # Cross-check against the pure-JAX reference of the PyTorch forward.
    a_ref, s_ref, h_ref = ran_reference(x, hidden, params)
    assert alpha.shape == (T, B, HIST) and sigma.shape == (T, B, F) and h_n.shape == (1, B, HIDDEN)
    assert jnp.allclose(alpha, a_ref, rtol=1e-4, atol=1e-4)
    assert jnp.allclose(sigma, s_ref, rtol=1e-4, atol=1e-4)
    assert jnp.allclose(h_n, h_ref, rtol=1e-4, atol=1e-4)

    print("KERNEL_OK")
</pallas_src>

<mosaic_0001>
module attributes {stable_mosaic.version = 11 : i64} {
  func.func @ran_kernel(%arg0: memref<64x4xf32, #tpu.memory_space<vmem>>, %arg1: memref<8x128xf32, #tpu.memory_space<vmem>>, %arg2: memref<4x384xf32, #tpu.memory_space<vmem>>, %arg3: memref<128x384xf32, #tpu.memory_space<vmem>>, %arg4: memref<128x256xf32, #tpu.memory_space<vmem>>, %arg5: memref<64x128xf32, #tpu.memory_space<vmem>>, %arg6: memref<64x128xf32, #tpu.memory_space<vmem>>, %arg7: memref<8x128xf32, #tpu.memory_space<vmem>>) attributes {dimension_semantics = [], scalar_prefetch = 0 : i64, scratch_operands = 0 : i64, tpu.core_type = #tpu.core_type<tc>} {
    %c0 = arith.constant 0 : index
    %c0_0 = arith.constant 0 : index
    %0 = vector.load %arg0[%c0, %c0_0] : memref<64x4xf32, #tpu.memory_space<vmem>>, vector<64x4xf32>
    %c0_1 = arith.constant 0 : index
    %c0_2 = arith.constant 0 : index
    %1 = vector.load %arg2[%c0_1, %c0_2] : memref<4x384xf32, #tpu.memory_space<vmem>>, vector<4x384xf32>
    %cst = arith.constant dense<0.000000e+00> : vector<64x384xf32>
    %2 = tpu.matmul %0, %1, %cst {dimension_numbers = #tpu.dot_dimension_numbers<[1], [0], [0], [1], [0, 0, 1, 1], [], []>} : vector<64x4xf32>, vector<4x384xf32>, vector<64x384xf32> -> vector<64x384xf32>
    %c0_3 = arith.constant 0 : index
    %c0_4 = arith.constant 0 : index
    %3 = vector.load %arg3[%c0_3, %c0_4] : memref<128x384xf32, #tpu.memory_space<vmem>>, vector<128x384xf32>
    %c0_5 = arith.constant 0 : index
    %c0_6 = arith.constant 0 : index
    %4 = vector.load %arg1[%c0_5, %c0_6] : memref<8x128xf32, #tpu.memory_space<vmem>>, vector<8x128xf32>
    %5 = vector.extract_strided_slice %2 {offsets = [0, 0], sizes = [8, 384], strides = [1, 1]} : vector<64x384xf32> to vector<8x384xf32>
    %cst_7 = arith.constant dense<0.000000e+00> : vector<8x384xf32>
    %6 = tpu.matmul %4, %3, %cst_7 {dimension_numbers = #tpu.dot_dimension_numbers<[1], [0], [0], [1], [0, 0, 1, 1], [], []>} : vector<8x128xf32>, vector<128x384xf32>, vector<8x384xf32> -> vector<8x384xf32>
    %7 = vector.extract_strided_slice %5 {offsets = [0, 0], sizes = [8, 128], strides = [1, 1]} : vector<8x384xf32> to vector<8x128xf32>
    %8 = vector.extract_strided_slice %6 {offsets = [0, 0], sizes = [8, 128], strides = [1, 1]} : vector<8x384xf32> to vector<8x128xf32>
    %9 = arith.addf %7, %8 : vector<8x128xf32>
    %10 = arith.negf %9 : vector<8x128xf32>
    %11 = math.exp %10 : vector<8x128xf32>
    %cst_8 = arith.constant 1.000000e+00 : f32
    %12 = vector.broadcast %cst_8 : f32 to vector<8x128xf32>
    %13 = arith.addf %12, %11 : vector<8x128xf32>
    %14 = arith.divf %12, %13 : vector<8x128xf32>
    %15 = vector.extract_strided_slice %5 {offsets = [0, 128], sizes = [8, 128], strides = [1, 1]} : vector<8x384xf32> to vector<8x128xf32>
    %16 = vector.extract_strided_slice %6 {offsets = [0, 128], sizes = [8, 128], strides = [1, 1]} : vector<8x384xf32> to vector<8x128xf32>
    %17 = arith.addf %15, %16 : vector<8x128xf32>
    %18 = arith.negf %17 : vector<8x128xf32>
    %19 = math.exp %18 : vector<8x128xf32>
    %cst_9 = arith.constant 1.000000e+00 : f32
    %20 = vector.broadcast %cst_9 : f32 to vector<8x128xf32>
    %21 = arith.addf %20, %19 : vector<8x128xf32>
    %22 = arith.divf %20, %21 : vector<8x128xf32>
    %23 = vector.extract_strided_slice %5 {offsets = [0, 256], sizes = [8, 128], strides = [1, 1]} : vector<8x384xf32> to vector<8x128xf32>
    %24 = vector.extract_strided_slice %6 {offsets = [0, 256], sizes = [8, 128], strides = [1, 1]} : vector<8x384xf32> to vector<8x128xf32>
    %25 = arith.mulf %14, %24 : vector<8x128xf32>
    %26 = arith.addf %23, %25 : vector<8x128xf32>
    %27 = math.tanh %26 : vector<8x128xf32>
    %cst_10 = arith.constant 1.000000e+00 : f32
    %28 = vector.broadcast %cst_10 : f32 to vector<8x128xf32>
    %29 = arith.subf %28, %22 : vector<8x128xf32>
    %30 = arith.mulf %29, %27 : vector<8x128xf32>
    %31 = arith.mulf %22, %4 : vector<8x128xf32>
    %32 = arith.addf %30, %31 : vector<8x128xf32>
    %33 = vector.extract_strided_slice %2 {offsets = [8, 0], sizes = [8, 384], strides = [1, 1]} : vector<64x384xf32> to vector<8x384xf32>
    %cst_11 = arith.constant dense<0.000000e+00> : vector<8x384xf32>
    %34 = tpu.matmul %32, %3, %cst_11 {dimension_numbers = #tpu.dot_dimension_numbers<[1], [0], [0], [1], [0, 0, 1, 1], [], []>} : vector<8x128xf32>, vector<128x384xf32>, vector<8x384xf32> -> vector<8x384xf32>
    %35 = vector.extract_strided_slice %33 {offsets = [0, 0], sizes = [8, 128], strides = [1, 1]} : vector<8x384xf32> to vector<8x128xf32>
    %36 = vector.extract_strided_slice %34 {offsets = [0, 0], sizes = [8, 128], strides = [1, 1]} : vector<8x384xf32> to vector<8x128xf32>
    %37 = arith.addf %35, %36 : vector<8x128xf32>
    %38 = arith.negf %37 : vector<8x128xf32>
    %39 = math.exp %38 : vector<8x128xf32>
    %cst_12 = arith.constant 1.000000e+00 : f32
    %40 = vector.broadcast %cst_12 : f32 to vector<8x128xf32>
    %41 = arith.addf %40, %39 : vector<8x128xf32>
    %42 = arith.divf %40, %41 : vector<8x128xf32>
    %43 = vector.extract_strided_slice %33 {offsets = [0, 128], sizes = [8, 128], strides = [1, 1]} : vector<8x384xf32> to vector<8x128xf32>
    %44 = vector.extract_strided_slice %34 {offsets = [0, 128], sizes = [8, 128], strides = [1, 1]} : vector<8x384xf32> to vector<8x128xf32>
    %45 = arith.addf %43, %44 : vector<8x128xf32>
    %46 = arith.negf %45 : vector<8x128xf32>
    %47 = math.exp %46 : vector<8x128xf32>
    %cst_13 = arith.constant 1.000000e+00 : f32
    %48 = vector.broadcast %cst_13 : f32 to vector<8x128xf32>
    %49 = arith.addf %48, %47 : vector<8x128xf32>
    %50 = arith.divf %48, %49 : vector<8x128xf32>
    %51 = vector.extract_strided_slice %33 {offsets = [0, 256], sizes = [8, 128], strides = [1, 1]} : vector<8x384xf32> to vector<8x128xf32>
    %52 = vector.extract_strided_slice %34 {offsets = [0, 256], sizes = [8, 128], strides = [1, 1]} : vector<8x384xf32> to vector<8x128xf32>
    %53 = arith.mulf %42, %52 : vector<8x128xf32>
    %54 = arith.addf %51, %53 : vector<8x128xf32>
    %55 = math.tanh %54 : vector<8x128xf32>
    %cst_14 = arith.constant 1.000000e+00 : f32
    %56 = vector.broadcast %cst_14 : f32 to vector<8x128xf32>
    %57 = arith.subf %56, %50 : vector<8x128xf32>
    %58 = arith.mulf %57, %55 : vector<8x128xf32>
    %59 = arith.mulf %50, %32 : vector<8x128xf32>
    %60 = arith.addf %58, %59 : vector<8x128xf32>
    %61 = vector.extract_strided_slice %2 {offsets = [16, 0], sizes = [8, 384], strides = [1, 1]} : vector<64x384xf32> to vector<8x384xf32>
    %cst_15 = arith.constant dense<0.000000e+00> : vector<8x384xf32>
    %62 = tpu.matmul %60, %3, %cst_15 {dimension_numbers = #tpu.dot_dimension_numbers<[1], [0], [0], [1], [0, 0, 1, 1], [], []>} : vector<8x128xf32>, vector<128x384xf32>, vector<8x384xf32> -> vector<8x384xf32>
    %63 = vector.extract_strided_slice %61 {offsets = [0, 0], sizes = [8, 128], strides = [1, 1]} : vector<8x384xf32> to vector<8x128xf32>
    %64 = vector.extract_strided_slice %62 {offsets = [0, 0], sizes = [8, 128], strides = [1, 1]} : vector<8x384xf32> to vector<8x128xf32>
    %65 = arith.addf %63, %64 : vector<8x128xf32>
    %66 = arith.negf %65 : vector<8x128xf32>
    %67 = math.exp %66 : vector<8x128xf32>
    %cst_16 = arith.constant 1.000000e+00 : f32
    %68 = vector.broadcast %cst_16 : f32 to vector<8x128xf32>
    %69 = arith.addf %68, %67 : vector<8x128xf32>
    %70 = arith.divf %68, %69 : vector<8x128xf32>
    %71 = vector.extract_strided_slice %61 {offsets = [0, 128], sizes = [8, 128], strides = [1, 1]} : vector<8x384xf32> to vector<8x128xf32>
    %72 = vector.extract_strided_slice %62 {offsets = [0, 128], sizes = [8, 128], strides = [1, 1]} : vector<8x384xf32> to vector<8x128xf32>
    %73 = arith.addf %71, %72 : vector<8x128xf32>
    %74 = arith.negf %73 : vector<8x128xf32>
    %75 = math.exp %74 : vector<8x128xf32>
    %cst_17 = arith.constant 1.000000e+00 : f32
    %76 = vector.broadcast %cst_17 : f32 to vector<8x128xf32>
    %77 = arith.addf %76, %75 : vector<8x128xf32>
    %78 = arith.divf %76, %77 : vector<8x128xf32>
    %79 = vector.extract_strided_slice %61 {offsets = [0, 256], sizes = [8, 128], strides = [1, 1]} : vector<8x384xf32> to vector<8x128xf32>
    %80 = vector.extract_strided_slice %62 {offsets = [0, 256], sizes = [8, 128], strides = [1, 1]} : vector<8x384xf32> to vector<8x128xf32>
    %81 = arith.mulf %70, %80 : vector<8x128xf32>
    %82 = arith.addf %79, %81 : vector<8x128xf32>
    %83 = math.tanh %82 : vector<8x128xf32>
    %cst_18 = arith.constant 1.000000e+00 : f32
    %84 = vector.broadcast %cst_18 : f32 to vector<8x128xf32>
    %85 = arith.subf %84, %78 : vector<8x128xf32>
    %86 = arith.mulf %85, %83 : vector<8x128xf32>
    %87 = arith.mulf %78, %60 : vector<8x128xf32>
    %88 = arith.addf %86, %87 : vector<8x128xf32>
    %89 = vector.extract_strided_slice %2 {offsets = [24, 0], sizes = [8, 384], strides = [1, 1]} : vector<64x384xf32> to vector<8x384xf32>
    %cst_19 = arith.constant dense<0.000000e+00> : vector<8x384xf32>
    %90 = tpu.matmul %88, %3, %cst_19 {dimension_numbers = #tpu.dot_dimension_numbers<[1], [0], [0], [1], [0, 0, 1, 1], [], []>} : vector<8x128xf32>, vector<128x384xf32>, vector<8x384xf32> -> vector<8x384xf32>
    %91 = vector.extract_strided_slice %89 {offsets = [0, 0], sizes = [8, 128], strides = [1, 1]} : vector<8x384xf32> to vector<8x128xf32>
    %92 = vector.extract_strided_slice %90 {offsets = [0, 0], sizes = [8, 128], strides = [1, 1]} : vector<8x384xf32> to vector<8x128xf32>
    %93 = arith.addf %91, %92 : vector<8x128xf32>
    %94 = arith.negf %93 : vector<8x128xf32>
    %95 = math.exp %94 : vector<8x128xf32>
    %cst_20 = arith.constant 1.000000e+00 : f32
    %96 = vector.broadcast %cst_20 : f32 to vector<8x128xf32>
    %97 = arith.addf %96, %95 : vector<8x128xf32>
    %98 = arith.divf %96, %97 : vector<8x128xf32>
    %99 = vector.extract_strided_slice %89 {offsets = [0, 128], sizes = [8, 128], strides = [1, 1]} : vector<8x384xf32> to vector<8x128xf32>
    %100 = vector.extract_strided_slice %90 {offsets = [0, 128], sizes = [8, 128], strides = [1, 1]} : vector<8x384xf32> to vector<8x128xf32>
    %101 = arith.addf %99, %100 : vector<8x128xf32>
    %102 = arith.negf %101 : vector<8x128xf32>
    %103 = math.exp %102 : vector<8x128xf32>
    %cst_21 = arith.constant 1.000000e+00 : f32
    %104 = vector.broadcast %cst_21 : f32 to vector<8x128xf32>
    %105 = arith.addf %104, %103 : vector<8x128xf32>
    %106 = arith.divf %104, %105 : vector<8x128xf32>
    %107 = vector.extract_strided_slice %89 {offsets = [0, 256], sizes = [8, 128], strides = [1, 1]} : vector<8x384xf32> to vector<8x128xf32>
    %108 = vector.extract_strided_slice %90 {offsets = [0, 256], sizes = [8, 128], strides = [1, 1]} : vector<8x384xf32> to vector<8x128xf32>
    %109 = arith.mulf %98, %108 : vector<8x128xf32>
    %110 = arith.addf %107, %109 : vector<8x128xf32>
    %111 = math.tanh %110 : vector<8x128xf32>
    %cst_22 = arith.constant 1.000000e+00 : f32
    %112 = vector.broadcast %cst_22 : f32 to vector<8x128xf32>
    %113 = arith.subf %112, %106 : vector<8x128xf32>
    %114 = arith.mulf %113, %111 : vector<8x128xf32>
    %115 = arith.mulf %106, %88 : vector<8x128xf32>
    %116 = arith.addf %114, %115 : vector<8x128xf32>
    %117 = vector.extract_strided_slice %2 {offsets = [32, 0], sizes = [8, 384], strides = [1, 1]} : vector<64x384xf32> to vector<8x384xf32>
    %cst_23 = arith.constant dense<0.000000e+00> : vector<8x384xf32>
    %118 = tpu.matmul %116, %3, %cst_23 {dimension_numbers = #tpu.dot_dimension_numbers<[1], [0], [0], [1], [0, 0, 1, 1], [], []>} : vector<8x128xf32>, vector<128x384xf32>, vector<8x384xf32> -> vector<8x384xf32>
    %119 = vector.extract_strided_slice %117 {offsets = [0, 0], sizes = [8, 128], strides = [1, 1]} : vector<8x384xf32> to vector<8x128xf32>
    %120 = vector.extract_strided_slice %118 {offsets = [0, 0], sizes = [8, 128], strides = [1, 1]} : vector<8x384xf32> to vector<8x128xf32>
    %121 = arith.addf %119, %120 : vector<8x128xf32>
    %122 = arith.negf %121 : vector<8x128xf32>
    %123 = math.exp %122 : vector<8x128xf32>
    %cst_24 = arith.constant 1.000000e+00 : f32
    %124 = vector.broadcast %cst_24 : f32 to vector<8x128xf32>
    %125 = arith.addf %124, %123 : vector<8x128xf32>
    %126 = arith.divf %124, %125 : vector<8x128xf32>
    %127 = vector.extract_strided_slice %117 {offsets = [0, 128], sizes = [8, 128], strides = [1, 1]} : vector<8x384xf32> to vector<8x128xf32>
    %128 = vector.extract_strided_slice %118 {offsets = [0, 128], sizes = [8, 128], strides = [1, 1]} : vector<8x384xf32> to vector<8x128xf32>
    %129 = arith.addf %127, %128 : vector<8x128xf32>
    %130 = arith.negf %129 : vector<8x128xf32>
    %131 = math.exp %130 : vector<8x128xf32>
    %cst_25 = arith.constant 1.000000e+00 : f32
    %132 = vector.broadcast %cst_25 : f32 to vector<8x128xf32>
    %133 = arith.addf %132, %131 : vector<8x128xf32>
    %134 = arith.divf %132, %133 : vector<8x128xf32>
    %135 = vector.extract_strided_slice %117 {offsets = [0, 256], sizes = [8, 128], strides = [1, 1]} : vector<8x384xf32> to vector<8x128xf32>
    %136 = vector.extract_strided_slice %118 {offsets = [0, 256], sizes = [8, 128], strides = [1, 1]} : vector<8x384xf32> to vector<8x128xf32>
    %137 = arith.mulf %126, %136 : vector<8x128xf32>
    %138 = arith.addf %135, %137 : vector<8x128xf32>
    %139 = math.tanh %138 : vector<8x128xf32>
    %cst_26 = arith.constant 1.000000e+00 : f32
    %140 = vector.broadcast %cst_26 : f32 to vector<8x128xf32>
    %141 = arith.subf %140, %134 : vector<8x128xf32>
    %142 = arith.mulf %141, %139 : vector<8x128xf32>
    %143 = arith.mulf %134, %116 : vector<8x128xf32>
    %144 = arith.addf %142, %143 : vector<8x128xf32>
    %145 = vector.extract_strided_slice %2 {offsets = [40, 0], sizes = [8, 384], strides = [1, 1]} : vector<64x384xf32> to vector<8x384xf32>
    %cst_27 = arith.constant dense<0.000000e+00> : vector<8x384xf32>
    %146 = tpu.matmul %144, %3, %cst_27 {dimension_numbers = #tpu.dot_dimension_numbers<[1], [0], [0], [1], [0, 0, 1, 1], [], []>} : vector<8x128xf32>, vector<128x384xf32>, vector<8x384xf32> -> vector<8x384xf32>
    %147 = vector.extract_strided_slice %145 {offsets = [0, 0], sizes = [8, 128], strides = [1, 1]} : vector<8x384xf32> to vector<8x128xf32>
    %148 = vector.extract_strided_slice %146 {offsets = [0, 0], sizes = [8, 128], strides = [1, 1]} : vector<8x384xf32> to vector<8x128xf32>
    %149 = arith.addf %147, %148 : vector<8x128xf32>
    %150 = arith.negf %149 : vector<8x128xf32>
    %151 = math.exp %150 : vector<8x128xf32>
    %cst_28 = arith.constant 1.000000e+00 : f32
    %152 = vector.broadcast %cst_28 : f32 to vector<8x128xf32>
    %153 = arith.addf %152, %151 : vector<8x128xf32>
    %154 = arith.divf %152, %153 : vector<8x128xf32>
    %155 = vector.extract_strided_slice %145 {offsets = [0, 128], sizes = [8, 128], strides = [1, 1]} : vector<8x384xf32> to vector<8x128xf32>
    %156 = vector.extract_strided_slice %146 {offsets = [0, 128], sizes = [8, 128], strides = [1, 1]} : vector<8x384xf32> to vector<8x128xf32>
    %157 = arith.addf %155, %156 : vector<8x128xf32>
    %158 = arith.negf %157 : vector<8x128xf32>
    %159 = math.exp %158 : vector<8x128xf32>
    %cst_29 = arith.constant 1.000000e+00 : f32
    %160 = vector.broadcast %cst_29 : f32 to vector<8x128xf32>
    %161 = arith.addf %160, %159 : vector<8x128xf32>
    %162 = arith.divf %160, %161 : vector<8x128xf32>
    %163 = vector.extract_strided_slice %145 {offsets = [0, 256], sizes = [8, 128], strides = [1, 1]} : vector<8x384xf32> to vector<8x128xf32>
    %164 = vector.extract_strided_slice %146 {offsets = [0, 256], sizes = [8, 128], strides = [1, 1]} : vector<8x384xf32> to vector<8x128xf32>
    %165 = arith.mulf %154, %164 : vector<8x128xf32>
    %166 = arith.addf %163, %165 : vector<8x128xf32>
    %167 = math.tanh %166 : vector<8x128xf32>
    %cst_30 = arith.constant 1.000000e+00 : f32
    %168 = vector.broadcast %cst_30 : f32 to vector<8x128xf32>
    %169 = arith.subf %168, %162 : vector<8x128xf32>
    %170 = arith.mulf %169, %167 : vector<8x128xf32>
    %171 = arith.mulf %162, %144 : vector<8x128xf32>
    %172 = arith.addf %170, %171 : vector<8x128xf32>
    %173 = vector.extract_strided_slice %2 {offsets = [48, 0], sizes = [8, 384], strides = [1, 1]} : vector<64x384xf32> to vector<8x384xf32>
    %cst_31 = arith.constant dense<0.000000e+00> : vector<8x384xf32>
    %174 = tpu.matmul %172, %3, %cst_31 {dimension_numbers = #tpu.dot_dimension_numbers<[1], [0], [0], [1], [0, 0, 1, 1], [], []>} : vector<8x128xf32>, vector<128x384xf32>, vector<8x384xf32> -> vector<8x384xf32>
    %175 = vector.extract_strided_slice %173 {offsets = [0, 0], sizes = [8, 128], strides = [1, 1]} : vector<8x384xf32> to vector<8x128xf32>
    %176 = vector.extract_strided_slice %174 {offsets = [0, 0], sizes = [8, 128], strides = [1, 1]} : vector<8x384xf32> to vector<8x128xf32>
    %177 = arith.addf %175, %176 : vector<8x128xf32>
    %178 = arith.negf %177 : vector<8x128xf32>
    %179 = math.exp %178 : vector<8x128xf32>
    %cst_32 = arith.constant 1.000000e+00 : f32
    %180 = vector.broadcast %cst_32 : f32 to vector<8x128xf32>
    %181 = arith.addf %180, %179 : vector<8x128xf32>
    %182 = arith.divf %180, %181 : vector<8x128xf32>
    %183 = vector.extract_strided_slice %173 {offsets = [0, 128], sizes = [8, 128], strides = [1, 1]} : vector<8x384xf32> to vector<8x128xf32>
    %184 = vector.extract_strided_slice %174 {offsets = [0, 128], sizes = [8, 128], strides = [1, 1]} : vector<8x384xf32> to vector<8x128xf32>
    %185 = arith.addf %183, %184 : vector<8x128xf32>
    %186 = arith.negf %185 : vector<8x128xf32>
    %187 = math.exp %186 : vector<8x128xf32>
    %cst_33 = arith.constant 1.000000e+00 : f32
    %188 = vector.broadcast %cst_33 : f32 to vector<8x128xf32>
    %189 = arith.addf %188, %187 : vector<8x128xf32>
    %190 = arith.divf %188, %189 : vector<8x128xf32>
    %191 = vector.extract_strided_slice %173 {offsets = [0, 256], sizes = [8, 128], strides = [1, 1]} : vector<8x384xf32> to vector<8x128xf32>
    %192 = vector.extract_strided_slice %174 {offsets = [0, 256], sizes = [8, 128], strides = [1, 1]} : vector<8x384xf32> to vector<8x128xf32>
    %193 = arith.mulf %182, %192 : vector<8x128xf32>
    %194 = arith.addf %191, %193 : vector<8x128xf32>
    %195 = math.tanh %194 : vector<8x128xf32>
    %cst_34 = arith.constant 1.000000e+00 : f32
    %196 = vector.broadcast %cst_34 : f32 to vector<8x128xf32>
    %197 = arith.subf %196, %190 : vector<8x128xf32>
    %198 = arith.mulf %197, %195 : vector<8x128xf32>
    %199 = arith.mulf %190, %172 : vector<8x128xf32>
    %200 = arith.addf %198, %199 : vector<8x128xf32>
    %201 = vector.extract_strided_slice %2 {offsets = [56, 0], sizes = [8, 384], strides = [1, 1]} : vector<64x384xf32> to vector<8x384xf32>
    %cst_35 = arith.constant dense<0.000000e+00> : vector<8x384xf32>
    %202 = tpu.matmul %200, %3, %cst_35 {dimension_numbers = #tpu.dot_dimension_numbers<[1], [0], [0], [1], [0, 0, 1, 1], [], []>} : vector<8x128xf32>, vector<128x384xf32>, vector<8x384xf32> -> vector<8x384xf32>
    %203 = vector.extract_strided_slice %201 {offsets = [0, 0], sizes = [8, 128], strides = [1, 1]} : vector<8x384xf32> to vector<8x128xf32>
    %204 = vector.extract_strided_slice %202 {offsets = [0, 0], sizes = [8, 128], strides = [1, 1]} : vector<8x384xf32> to vector<8x128xf32>
    %205 = arith.addf %203, %204 : vector<8x128xf32>
    %206 = arith.negf %205 : vector<8x128xf32>
    %207 = math.exp %206 : vector<8x128xf32>
    %cst_36 = arith.constant 1.000000e+00 : f32
    %208 = vector.broadcast %cst_36 : f32 to vector<8x128xf32>
    %209 = arith.addf %208, %207 : vector<8x128xf32>
    %210 = arith.divf %208, %209 : vector<8x128xf32>
    %211 = vector.extract_strided_slice %201 {offsets = [0, 128], sizes = [8, 128], strides = [1, 1]} : vector<8x384xf32> to vector<8x128xf32>
    %212 = vector.extract_strided_slice %202 {offsets = [0, 128], sizes = [8, 128], strides = [1, 1]} : vector<8x384xf32> to vector<8x128xf32>
    %213 = arith.addf %211, %212 : vector<8x128xf32>
    %214 = arith.negf %213 : vector<8x128xf32>
    %215 = math.exp %214 : vector<8x128xf32>
    %cst_37 = arith.constant 1.000000e+00 : f32
    %216 = vector.broadcast %cst_37 : f32 to vector<8x128xf32>
    %217 = arith.addf %216, %215 : vector<8x128xf32>
    %218 = arith.divf %216, %217 : vector<8x128xf32>
    %219 = vector.extract_strided_slice %201 {offsets = [0, 256], sizes = [8, 128], strides = [1, 1]} : vector<8x384xf32> to vector<8x128xf32>
    %220 = vector.extract_strided_slice %202 {offsets = [0, 256], sizes = [8, 128], strides = [1, 1]} : vector<8x384xf32> to vector<8x128xf32>
    %221 = arith.mulf %210, %220 : vector<8x128xf32>
    %222 = arith.addf %219, %221 : vector<8x128xf32>
    %223 = math.tanh %222 : vector<8x128xf32>
    %cst_38 = arith.constant 1.000000e+00 : f32
    %224 = vector.broadcast %cst_38 : f32 to vector<8x128xf32>
    %225 = arith.subf %224, %218 : vector<8x128xf32>
    %226 = arith.mulf %225, %223 : vector<8x128xf32>
    %227 = arith.mulf %218, %200 : vector<8x128xf32>
    %228 = arith.addf %226, %227 : vector<8x128xf32>
    %c0_39 = arith.constant 0 : index
    %c0_40 = arith.constant 0 : index
    %229 = vector.load %arg7[%c0_39, %c0_40] : memref<8x128xf32, #tpu.memory_space<vmem>>, vector<8x128xf32>
    tpu.vector_store %arg7[%c0_39, %c0_40], %228 {strides = array<i32>} : memref<8x128xf32, #tpu.memory_space<vmem>>, vector<8x128xf32>,
    %230 = tpu.concatenate %32, %60, %88, %116, %144, %172, %200, %228 in 0 : vector<8x128xf32>, vector<8x128xf32>, vector<8x128xf32>, vector<8x128xf32>, vector<8x128xf32>, vector<8x128xf32>, vector<8x128xf32>, vector<8x128xf32> -> vector<64x128xf32>
    %c0_41 = arith.constant 0 : index
    %c0_42 = arith.constant 0 : index
    %231 = vector.load %arg4[%c0_41, %c0_42] : memref<128x256xf32, #tpu.memory_space<vmem>>, vector<128x256xf32>
    %cst_43 = arith.constant dense<0.000000e+00> : vector<64x256xf32>
    %232 = tpu.matmul %230, %231, %cst_43 {dimension_numbers = #tpu.dot_dimension_numbers<[1], [0], [0], [1], [0, 0, 1, 1], [], []>} : vector<64x128xf32>, vector<128x256xf32>, vector<64x256xf32> -> vector<64x256xf32>
    %233 = vector.extract_strided_slice %232 {offsets = [0, 0], sizes = [64, 128], strides = [1, 1]} : vector<64x256xf32> to vector<64x128xf32>
    %234 = tpu.iota {dimensions = array<i32: 1>} : vector<64x128xi32>
    %c8_i32 = arith.constant 8 : i32
    %235 = vector.broadcast %c8_i32 : i32 to vector<64x128xi32>
    %236 = arith.cmpi slt, %234, %235 : vector<64x128xi32>
    %cst_44 = arith.constant -1.000000e+30 : f32
    %237 = vector.broadcast %cst_44 : f32 to vector<64x128xf32>
    %238 = arith.select %236, %233, %237 : vector<64x128xi1>, vector<64x128xf32>
    %cst_45 = arith.constant dense<0xFF800000> : vector<64xf32>
    %239 = vector.multi_reduction <maximumf>, %238, %cst_45 [1] : vector<64x128xf32> to vector<64xf32>
    %240 = vector.shape_cast %239 : vector<64xf32> to vector<64x1xf32>
    %241 = vector.broadcast %240 : vector<64x1xf32> to vector<64x128xf32>
    %242 = arith.subf %238, %241 : vector<64x128xf32>
    %243 = math.exp %242 : vector<64x128xf32>
    %cst_46 = arith.constant dense<0.000000e+00> : vector<64xf32>
    %244 = vector.multi_reduction <add>, %243, %cst_46 [1] : vector<64x128xf32> to vector<64xf32>
    %245 = vector.shape_cast %244 : vector<64xf32> to vector<64x1xf32>
    %246 = vector.broadcast %245 : vector<64x1xf32> to vector<64x128xf32>
    %247 = arith.divf %243, %246 : vector<64x128xf32>
    %c0_47 = arith.constant 0 : index
    %c0_48 = arith.constant 0 : index
    %248 = vector.load %arg5[%c0_47, %c0_48] : memref<64x128xf32, #tpu.memory_space<vmem>>, vector<64x128xf32>
    tpu.vector_store %arg5[%c0_47, %c0_48], %247 {strides = array<i32>} : memref<64x128xf32, #tpu.memory_space<vmem>>, vector<64x128xf32>,
    %249 = vector.extract_strided_slice %232 {offsets = [0, 128], sizes = [64, 128], strides = [1, 1]} : vector<64x256xf32> to vector<64x128xf32>
    %250 = math.exp %249 : vector<64x128xf32>
    %c0_49 = arith.constant 0 : index
    %c0_50 = arith.constant 0 : index
    %251 = vector.load %arg6[%c0_49, %c0_50] : memref<64x128xf32, #tpu.memory_space<vmem>>, vector<64x128xf32>
    tpu.vector_store %arg6[%c0_49, %c0_50], %250 {strides = array<i32>} : memref<64x128xf32, #tpu.memory_space<vmem>>, vector<64x128xf32>,
    return
  }
}

</mosaic_0001>

<bundles_post_ra>
// kernel: tpu_custom_call.1
= control target key start
LH: loop header
LB: loop body
LE: loop exit
PB: predicated region body
PF: predicated region fallthrough
CT: control target
= control target key end

     0   :  { %13 = vsyncpa [#allocation3], 0  ;;  %s3848_s0 = inlined_call_operand.vmem [shape: f32[64,4], index: 0, kind: input, shape index: {}]   ;;  %s3849_s1 = inlined_call_operand.vmem [shape: f32[8,128], index: 1, kind: input, shape index: {}]   ;;  %s3850_s2 = inlined_call_operand.vmem [shape: f32[4,384], index: 2, kind: input, shape index: {}]   ;;  %s3851_s3 = inlined_call_operand.hbm [shape: f32[128,384], index: 3, kind: input, shape index: {}]   ;;  %s3852_s4 = inlined_call_operand.hbm [shape: f32[128,256], index: 4, kind: input, shape index: {}]   ;;  %s3853_s5 = inlined_call_operand.hbm [shape: f32[64,128], index: 5, kind: output, shape index: {0}]   ;;  %s3854_s6 = inlined_call_operand.hbm [shape: f32[64,128], index: 6, kind: output, shape index: {1}]   ;;  %s3855_s7 = inlined_call_operand.hbm [shape: f32[8,128], index: 7, kind: output, shape index: {2}]  }
   0x1   :  { %14 = vsyncpa [#allocation6], 0 }
   0x2   :  { %15 = vsyncpa [#allocation4], 0 }
   0x3   :  { %16 = vsyncpa [#allocation9], 0  ;;  %s3200_s24 = smov [#allocation2]   ;;  %s3082_s28 = scalar_lea.hbm %s3851_s3, 6144 }
   0x4   :  { %s28_s25 = sshll.u32 %s3200_s24, 4  ;;  %p3083_p0 = scmp.ne.s32.totalorder %s3851_s3, %s3082_s28  ;;  %s29_s25 = int_to_ptr.vmem [resolvable:$true] %s28_s25 }
   0x5   :  { %p3086_p1 = scmp.lt.u32.totalorder %s3082_s28, %s3851_s3 }
   0x7   :  { %p3088_p2 = pnand %p3086_p1, %p3083_p0 }
   0x9   :  { %3091 = shalt.err (!%p3088_p2)
}
   0xa   :  { %s3092_s10 = scalar_lea.vmem %s29_s25, 6144  ;;  %p3097_p4 = scmp.lt.s32.totalorder %s29_s25, %s29_s25 }
   0xb   :  { %p3093_p3 = scmp.ne.s32.totalorder %s29_s25, %s3092_s10  ;;  %p3098_p5 = scmp.lt.s32.totalorder %s3092_s10, %s3092_s10 }
   0xd   :  { %p3099_p6 = por %p3098_p5, %p3097_p4 }
   0xf   :  { %p3100_p7 = pnand %p3099_p6, %p3093_p3 }
  0x11   :  { %3103 = shalt.err (!%p3100_p7)
}
  0x12   :  { %s3201_s11 = smov 384   ;;  %s3202_s12 = smov 24  }
  0x13   :  { %34 = dma.hbm_to_vmem [thread:$0]  %s3851_s3, 6144, %s29_s25, [#allocation3], %s3201_s11, %s3201_s11, %s3202_s12  }
  0x14   :  { %s3203_s15 = smov [#allocation5]   ;;  %s3104_s19 = scalar_lea.hbm %s3852_s4, 4096 }
  0x15   :  { %s40_s16 = sshll.u32 %s3203_s15, 4  ;;  %p3105_p8 = scmp.ne.s32.totalorder %s3852_s4, %s3104_s19  ;;  %s41_s16 = int_to_ptr.vmem [resolvable:$true] %s40_s16 }
  0x16   :  { %p3108_p9 = scmp.lt.u32.totalorder %s3104_s19, %s3852_s4 }
  0x18   :  { %p3110_p10 = pnand %p3108_p9, %p3105_p8 }
  0x1a   :  { %3113 = shalt.err (!%p3110_p10)
}
  0x1b   :  { %s3114_s24 = scalar_lea.vmem %s41_s16, 4096  ;;  %p3119_p12 = scmp.lt.s32.totalorder %s41_s16, %s41_s16 }
  0x1c   :  { %p3115_p11 = scmp.ne.s32.totalorder %s41_s16, %s3114_s24  ;;  %p3120_p13 = scmp.lt.s32.totalorder %s3114_s24, %s3114_s24 }
  0x1e   :  { %p3121_p0 = por %p3120_p13, %p3119_p12 }
  0x20   :  { %p3122_p1 = pnand %p3121_p0, %p3115_p11 }
  0x22   :  { %3125 = shalt.err (!%p3122_p1)
}
  0x23   :  { %s3204_s3 = smov 256   ;;  %s3205_s25 = smov 16  }
  0x24   :  { %46 = dma.hbm_to_vmem [thread:$0]  %s3852_s4, 4096, %s41_s16, [#allocation6], %s3204_s3, %s3204_s3, %s3205_s25  }
  0x25   :  { %3192 = dma.done.wait [#allocation3], 6144  }
  0x26   :  { %3193 = vsyncadd [#allocation3], 4294961152 }
  0x27   :  { %3194 = dma.done.wait [#allocation6], 4096  }
  0x28   :  { %3195 = vsyncadd [#allocation6], 4294963200  ;;  %v3206_v0 = vmov 0.0   ;;  %vm91_vm0 = vcmask 1043456   ;;  %vm66_vm1 = vcmask 31744   ;;  %v3285_v2 = vld [vmem:[%s3848_s0] sm:$0xff] }
  0x29   :  { %162 = vmatprep.mubr.f32.mxu0 %v3206_v0  ;;  %v62_v1 = vld [vmem:[%s3850_s2 + $0x8] sm:$0xf]  ;;  %2151 = vmatprep.mubr.msk.f32.mxu1 %vm66_vm1, %v3285_v2  ;;  %v320_v5 = vld [vmem:[#allocation2 + $0x20] sm:$0xff]  ;;  %v319_v8 = vld [vmem:[#allocation2 + $0x18] sm:$0xff]  ;;  %vm3208_vm2 = vmmov 0  }
  0x2a   :  { %v3290_v3 = vld [vmem:[%s3848_s0 + $0x8] sm:$0xff]  ;;  %2149 = vmatprep.subr.msk.mxu1 %vm91_vm0, %v62_v1  ;;  %v316_v6 = vld [vmem:[#allocation2] sm:$0xff]  ;;  %v323_v9 = vld [vmem:[#allocation2 + $0x38] sm:$0xff] }
  0x2b   :  { %v317_v4 = vld [vmem:[#allocation2 + $0x8] sm:$0xff]  ;;  %2150 = vmatpush3.msk.msra.mxu1 %vm91_vm0, %v62_v1  ;;  %v326_v10 = vld [vmem:[#allocation2 + $0x50] sm:$0xff]  ;;  %v3300_v11 = vpack.c.bf16 %v319_v8, %v316_v6  ;;  %v332_v16 = vld [vmem:[#allocation2 + $0x80] sm:$0xff]  ;;  %v3207_v1 = vmov 0.0|0.0  }
  0x2c   :  { %v3296_v7 = vpack.c.bf16 %v320_v5, %v317_v4  ;;  %2152 = vmatmul.mubr.msk.f32.vlgmr.msra.gmra.mrb[0].mxu1 %vm66_vm1, %v3290_v3  ;;  %v3302_v12 = vpack.c.bf16 %v326_v10, %v323_v9  ;;  %v322_v13 = vld [vmem:[#allocation2 + $0x30] sm:$0xff]  ;;  %v325_v14 = vld [vmem:[#allocation2 + $0x48] sm:$0xff]  ;;  %v328_v19 = vld [vmem:[#allocation2 + $0x60] sm:$0xff] }
  0x2d   :  { %v329_v15 = vld [vmem:[#allocation2 + $0x68] sm:$0xff]  ;;  %v3306_v17 = vpack.c.bf16 %v325_v14, %v322_v13  ;;  %v331_v20 = vld [vmem:[#allocation2 + $0x78] sm:$0xff]  ;;  %v338_v22 = vld [vmem:[#allocation2 + $0xb0] sm:$0xff] }
  0x2e   :  { %2444 = vmatprep.subr.bf16.mxu1 %v3296_v7  ;;  %v3309_v18 = vpack.c.bf16 %v332_v16, %v329_v15  ;;  %v335_v21 = vld [vmem:[#allocation2 + $0x98] sm:$0xff]  ;;  %v3314_v23 = vld [vmem:[%s3848_s0 + $0x10] sm:$0xff]  ;;  %v3324_v25 = vpack.c.bf16 %v331_v20, %v328_v19  ;;  %v3329_v26 = vld [vmem:[%s3848_s0 + $0x20] sm:$0xff] }
  0x2f   :  { %2446 = vmatpush1.bf16.msra.mxu1 %v3300_v11  ;;  %2154 = vmatprep.mubr.msk.f32.mxu1 %vm66_vm1, %v3314_v23  ;;  %v3321_v24 = vld [vmem:[%s3848_s0 + $0x18] sm:$0xff]  ;;  %v3332_v27 = vpack.c.bf16 %v338_v22, %v335_v21  ;;  %v334_v28 = vld [vmem:[#allocation2 + $0x90] sm:$0xff]  ;;  %v337_v29 = vld [vmem:[#allocation2 + $0xa8] sm:$0xff] }
  0x30   :  { %2448 = vmatprep.subr.bf16.mxu1 %v3302_v12  ;;  %2155 = vmatmul.mubr.msk.f32.gmra.mrb[2].mxu1 %vm66_vm1, %v3321_v24  ;;  %v341_v30 = vld [vmem:[#allocation2 + $0xc8] sm:$0xff]  ;;  %v344_v31 = vld [vmem:[#allocation2 + $0xe0] sm:$0xff]  ;;  %v3346_v33 = vld [vmem:[%s3848_s0 + $0x30] sm:$0xff]  ;;  %v3349_v34 = vpack.c.bf16 %v337_v29, %v334_v28 }
  0x31   :  { %2157 = vmatprep.mubr.msk.f32.mxu1 %vm66_vm1, %v3329_v26  ;;  %v3341_v32 = vld [vmem:[%s3848_s0 + $0x28] sm:$0xff]  ;;  %v61_v35 = vld [vmem:[%s3850_s2] sm:$0xff]  ;;  %v3355_v36 = vpack.c.bf16 %v344_v31, %v341_v30  ;;  %v343_v38 = vld [vmem:[#allocation2 + $0xd8] sm:$0xff] }
  0x32   :  { %v340_v37 = vld [vmem:[#allocation2 + $0xc0] sm:$0xff]  ;;  %v65_v39 = vcombine.high %v61_v35, %v61_v35  ;;  %v347_v40 = vld [vmem:[#allocation2 + $0xf8] sm:$0xff]  ;;  %v350_v41 = vld [vmem:[#allocation2 + $0x110] sm:$0xff] }
  0x33   :  { %2450 = vmatpush1.bf16.msra.mxu1 %v3306_v17  ;;  %v3364_v42 = vld [vmem:[%s3848_s0 + $0x38] sm:$0xff]  ;;  %v3368_v43 = vpack.c.bf16 %v343_v38, %v340_v37  ;;  %v3372_v44 = vpack.c.bf16 %v350_v41, %v347_v40  ;;  %v346_v45 = vld [vmem:[#allocation2 + $0xf0] sm:$0xff]  ;;  %v349_v46 = vld [vmem:[#allocation2 + $0x108] sm:$0xff] }
  0x34   :  { %2452 = vmatprep.subr.bf16.mxu1 %v3309_v18  ;;  %2158 = vmatmul.mubr.msk.f32.gmra.mrb[4].mxu1 %vm66_vm1, %v3341_v32  ;;  %v353_v47 = vld [vmem:[#allocation2 + $0x128] sm:$0xff]  ;;  %v356_v48 = vld [vmem:[#allocation2 + $0x140] sm:$0xff]  ;;  %v3382_v49 = vpack.c.bf16 %v349_v46, %v346_v45  ;;  %v355_v52 = vld [vmem:[#allocation2 + $0x138] sm:$0xff] }
  0x35   :  { %2160 = vmatprep.mubr.msk.f32.mxu1 %vm66_vm1, %v3346_v33  ;;  %1969 = vmatprep.subr.msk.mxu0 %vm91_vm0, %v65_v39  ;;  %v3386_v50 = vpack.c.bf16 %v356_v48, %v353_v47  ;;  %v352_v51 = vld [vmem:[#allocation2 + $0x120] sm:$0xff]  ;;  %v359_v53 = vld [vmem:[#allocation2 + $0x158] sm:$0xff]  ;;  %v362_v54 = vld [vmem:[#allocation2 + $0x170] sm:$0xff] }
  0x36   :  { %1970 = vmatpush1.msk.msra.mxu0 %vm91_vm0, %v61_v35  ;;  %v3393_v55 = vpack.c.bf16 %v355_v52, %v352_v51  ;;  %v3397_v56 = vpack.c.bf16 %v362_v54, %v359_v53  ;;  %v358_v57 = vld [vmem:[#allocation2 + $0x150] sm:$0xff]  ;;  %v361_v58 = vld [vmem:[#allocation2 + $0x168] sm:$0xff]  ;;  %v3416_v62 = vld [vmem:[%s3849_s1] sm:$0xff]  ;;  %s3209_s1 = smov [#allocation8]  }
  0x37   :  { %2454 = vmatpush1.bf16.msra.mxu1 %v3324_v25  ;;  %1971 = vmatmul.mubr.msk.f32.vlgmr.msra.gmra.mrb[0].mxu0 %vm66_vm1, %v3285_v2  ;;  %v3404_v59 = vpack.c.bf16 %v361_v58, %v358_v57  ;;  %v318_v60 = vld [vmem:[#allocation2 + $0x10] sm:$0xff]  ;;  %v321_v61 = vld [vmem:[#allocation2 + $0x28] sm:$0xff]  ;;  %v324_v2 = vld [vmem:[#allocation2 + $0x40] sm:$0xff]  ;;  %s1939_s24 = sshll.u32 %s3209_s1, 4  ;;  %s1940_s24 = int_to_ptr.vmem [resolvable:$true] %s1939_s24 }
  0x38   :  { %2456 = vmatprep.subr.bf16.mxu1 %v3332_v27  ;;  %2161 = vmatmul.mubr.msk.f32.gmra.mrb[6].mxu1 %vm66_vm1, %v3364_v42  ;;  %v3418_v63 = vpack.c.bf16 %v321_v61, %v318_v60  ;;  %v330_v5 = vld [vmem:[#allocation2 + $0x70] sm:$0xff]  ;;  %v333_v6 = vld [vmem:[#allocation2 + $0x88] sm:$0xff]  ;;  %v336_v9 = vld [vmem:[#allocation2 + $0xa0] sm:$0xff]  ;;  %s3126_s3 = scalar_lea.vmem %s1940_s24, 1024  ;;  %p3131_p3 = scmp.lt.s32.totalorder %s1940_s24, %s1940_s24 }
  0x39   :  { %429 = vmatprep.mubr.f32.mxu1 %v3206_v0  ;;  %2500 = vmatprep.subr.bf16.mxu0 %v3296_v7  ;;  %v3439_v8 = vpack.c.bf16 %v333_v6, %v330_v5  ;;  %v339_v10 = vld [vmem:[#allocation2 + $0xb8] sm:$0xff]  ;;  %v342_v14 = vld [vmem:[#allocation2 + $0xd0] sm:$0xff]  ;;  %v345_v15 = vld [vmem:[#allocation2 + $0xe8] sm:$0xff]  ;;  %p3127_p2 = scmp.ne.s32.totalorder %s1940_s24, %s3126_s3  ;;  %p3132_p4 = scmp.lt.s32.totalorder %s3126_s3, %s3126_s3 }
  0x3a   :  { %168 = vmatprep.mubr.f32.mxu0 %v3206_v0  ;;  %2502 = vmatpush1.bf16.msra.mxu0 %v3300_v11  ;;  %v3448_v13 = vpack.c.bf16 %v339_v10, %v336_v9  ;;  %v3457_v16 = vpack.c.bf16 %v345_v15, %v342_v14  ;;  %v348_v19 = vld [vmem:[#allocation2 + $0x100] sm:$0xff]  ;;  %v351_v20 = vld [vmem:[#allocation2 + $0x118] sm:$0xff]  ;;  %v354_v22 = vld [vmem:[#allocation2 + $0x130] sm:$0xff] }
  0x3b   :  { %2458 = vmatpush1.bf16.msra.mxu1 %v3349_v34  ;;  %2504 = vmatprep.subr.bf16.mxu0 %v3302_v12  ;;  %v3463_v21 = vpack.c.bf16 %v351_v20, %v348_v19  ;;  %v363_v28 = vld [vmem:[#allocation2 + $0x178] sm:$0xff]  ;;  %p3133_p5 = por %p3132_p4, %p3131_p3 }
  0x3c   :  { %2460 = vmatprep.subr.bf16.mxu1 %v3355_v36  ;;  %1972 = vmatmul.mubr.msk.f32.gmra.mrb[2].mxu0 %vm66_vm1, %v3290_v3  ;;  %v327_v3 = vld [vmem:[#allocation2 + $0x58] sm:$0xff] }
  0x3d   :  { %174 = vmatprep.mubr.f32.mxu0 %v3206_v0  ;;  %v3428_v4 = vpack.c.bf16 %v327_v3, %v324_v2  ;;  %p3134_p6 = pnand %p3133_p5, %p3127_p2 }
  0x3e   :  { %2506 = vmatpush1.bf16.msra.mxu0 %v3306_v17 }
  0x3f   :  { %2462 = vmatpush1.bf16.msra.mxu1 %v3368_v43  ;;  %2508 = vmatprep.subr.bf16.mxu0 %v3309_v18 }
  0x40   :  { %2464 = vmatprep.subr.bf16.mxu1 %v3372_v44  ;;  %1973 = vmatmul.mubr.msk.f32.gmra.mrb[4].mxu0 %vm66_vm1, %v3314_v23  ;;  %v357_v23 = vld [vmem:[#allocation2 + $0x148] sm:$0xff] }
  0x41   :  { %180 = vmatprep.mubr.f32.mxu0 %v3206_v0 }
  0x42   :  { %2510 = vmatpush1.bf16.msra.mxu0 %v3324_v25 }
  0x43   :  { %2466 = vmatpush1.bf16.msra.mxu1 %v3382_v49  ;;  %2512 = vmatprep.subr.bf16.mxu0 %v3332_v27 }
  0x44   :  { %2468 = vmatprep.subr.bf16.mxu1 %v3386_v50  ;;  %1974 = vmatmul.mubr.msk.f32.gmra.mrb[6].mxu0 %vm66_vm1, %v3321_v24  ;;  %v3467_v24 = vpack.c.bf16 %v357_v23, %v354_v22 }
  0x45   :  { %186 = vmatprep.mubr.f32.mxu0 %v3206_v0 }
  0x46   :  { %2514 = vmatpush1.bf16.msra.mxu0 %v3349_v34 }
  0x47   :  { %2470 = vmatpush1.bf16.msra.mxu1 %v3393_v55  ;;  %2516 = vmatprep.subr.bf16.mxu0 %v3355_v36 }
  0x48   :  { %2472 = vmatprep.subr.bf16.mxu1 %v3397_v56  ;;  %1975 = vmatmul.mubr.msk.f32.gmra.mrb[8].mxu0 %vm66_vm1, %v3329_v26  ;;  %v360_v26 = vld [vmem:[#allocation2 + $0x160] sm:$0xff] }
  0x49   :  { %192 = vmatprep.mubr.f32.mxu0 %v3206_v0  ;;  %v3471_v29 = vpack.c.bf16 %v363_v28, %v360_v26 }
  0x4a   :  { %2518 = vmatpush1.bf16.msra.mxu0 %v3368_v43 }
  0x4b   :  { %2474 = vmatpush1.bf16.msra.mxu1 %v3404_v59  ;;  %2520 = vmatprep.subr.bf16.mxu0 %v3372_v44 }
  0x4c   :  { %2475 = vmatprep.subr.bf16.mxu1 %v3207_v1  ;;  %1976 = vmatmul.mubr.msk.f32.gmra.mrb[10].mxu0 %vm66_vm1, %v3341_v32 }
  0x4d   :  { %198 = vmatprep.mubr.f32.mxu0 %v3206_v0 }
  0x4e   :  { %430 = vmatmul.mubr.f32.vlgmr.msra.gmra.mrb[8].mxu1 %v3416_v62  ;;  %2522 = vmatpush1.bf16.msra.mxu0 %v3382_v49 }
  0x4f   :  { %2477 = vmatpush3.bf16.msra.mxu1 %v3418_v63  ;;  %2195 = vmatprep.mubr.msk.f32.mxu1 %vm3208_vm2, %v3206_v0 }
  0x50   :  { %2478 = vmatprep.subr.bf16.mxu1 %v3207_v1  ;;  %2524 = vmatprep.subr.bf16.mxu0 %v3386_v50 }
  0x51   :  { %1977 = vmatmul.mubr.msk.f32.gmra.mrb[12].mxu0 %vm66_vm1, %v3346_v33 }
  0x52   :  { %204 = vmatprep.mubr.f32.mxu0 %v3206_v0  ;;  %2526 = vmatpush1.bf16.msra.mxu0 %v3393_v55 }
  0x53   :  { %2480 = vmatpush3.bf16.msra.mxu1 %v3428_v4  ;;  %2528 = vmatprep.subr.bf16.mxu0 %v3397_v56 }
  0x54   :  { %2481 = vmatprep.subr.bf16.mxu1 %v3207_v1 }
  0x55   :  { %1978 = vmatmul.mubr.msk.f32.gmra.mrb[14].mxu0 %vm66_vm1, %v3364_v42 }
  0x56   :  { %591 = vmatprep.mubr.f32.mxu0 %v3206_v0  ;;  %2530 = vmatpush1.bf16.msra.mxu0 %v3404_v59 }
  0x57   :  { %2483 = vmatpush3.bf16.msra.mxu1 %v3439_v8  ;;  %2556 = vmatprep.subr.bf16.mxu0 %v3296_v7 }
  0x58   :  { %2484 = vmatprep.subr.bf16.mxu1 %v3207_v1 }
  0x5b   :  { %2486 = vmatpush3.bf16.msra.mxu1 %v3448_v13 }
  0x5c   :  { %2487 = vmatprep.subr.bf16.mxu1 %v3207_v1 }
  0x5f   :  { %2489 = vmatpush3.bf16.msra.mxu1 %v3457_v16 }
  0x60   :  { %2490 = vmatprep.subr.bf16.mxu1 %v3207_v1 }
  0x63   :  { %2492 = vmatpush3.bf16.msra.mxu1 %v3463_v21 }
  0x64   :  { %2493 = vmatprep.subr.bf16.mxu1 %v3207_v1 }
  0x67   :  { %2495 = vmatpush3.bf16.msra.mxu1 %v3467_v24 }
  0x68   :  { %2496 = vmatprep.subr.bf16.mxu1 %v3207_v1 }
  0x6b   :  { %2498 = vmatpush3.bf16.msra.mxu1 %v3471_v29 }
  0x6c   :  { %2531 = vmatprep.subr.bf16.mxu1 %v3207_v1 }
  0x6e   :  { %2196 = vmatmul.mubr.f32.vlgmr.msra.gmra.mrb[10].mxu1 %v3416_v62 }
  0x6f   :  { %2533 = vmatpush3.bf16.msra.mxu1 %v3418_v63  ;;  %2230 = vmatprep.mubr.msk.f32.mxu1 %vm3208_vm2, %v3206_v0 }
  0x70   :  { %2534 = vmatprep.subr.bf16.mxu1 %v3207_v1 }
  0x73   :  { %2536 = vmatpush3.bf16.msra.mxu1 %v3428_v4 }
  0x74   :  { %2537 = vmatprep.subr.bf16.mxu1 %v3207_v1 }
  0x77   :  { %2539 = vmatpush3.bf16.msra.mxu1 %v3439_v8 }
  0x78   :  { %2540 = vmatprep.subr.bf16.mxu1 %v3207_v1 }
  0x7b   :  { %2542 = vmatpush3.bf16.msra.mxu1 %v3448_v13 }
  0x7c   :  { %2543 = vmatprep.subr.bf16.mxu1 %v3207_v1 }
  0x7f   :  { %2545 = vmatpush3.bf16.msra.mxu1 %v3457_v16 }
  0x80   :  { %2546 = vmatprep.subr.bf16.mxu1 %v3207_v1 }
  0x83   :  { %2548 = vmatpush3.bf16.msra.mxu1 %v3463_v21 }
  0x84   :  { %2549 = vmatprep.subr.bf16.mxu1 %v3207_v1 }
  0x87   :  { %2551 = vmatpush3.bf16.msra.mxu1 %v3467_v24 }
  0x88   :  { %2552 = vmatprep.subr.bf16.mxu1 %v3207_v1 }
  0x8b   :  { %2554 = vmatpush3.bf16.msra.mxu1 %v3471_v29 }
  0x8c   :  { %2587 = vmatprep.subr.bf16.mxu1 %v3207_v1 }
  0xff   :  { %v3495_v30 = vpop.f32.mrb[0].mxu1 }
 0x100   :  { %v277_v31 = vpop.f32.mrb[1].mxu1 }
 0x103   :  { %v3497_v32 = vpop.f32.mrb[2].mxu1 }
 0x104   :  { %v3499_v33 = vpop.f32.mrb[3].mxu1 }
 0x107   :  { %v3501_v35 = vpop.f32.mrb[4].mxu1 }
 0x108   :  { %v3503_v37 = vpop.f32.mrb[5].mxu1 }
 0x10a   :  { %v164_v40 = vpop.f32.mrb[0].mxu0 }
 0x10b   :  { %v3505_v38 = vpop.f32.mrb[6].mxu1  ;;  %v166_v41 = vpop.f32.mrb[1].mxu0 }
 0x10c   :  { %v3507_v39 = vpop.f32.mrb[7].mxu1 }
 0x121   :  { %v431_v42 = vpop.f32.mrb[8].mxu1 }
 0x122   :  { %v506_v45 = vadd.f32 %v431_v42, %v164_v40  ;;  %v433_v46 = vpop.f32.mrb[9].mxu1 }
 0x123   :  { %v513_v47 = vadd.f32 %v433_v46, %v166_v41 }
 0x124   :  { %v1988_v48 = vmul.f32 -1.442695, %v506_v45 }
 0x125   :  { %v1989_v51 = vmul.f32 -1.442695, %v513_v47 }
 0x126   :  { %2954 = vpow2.f32 %v1988_v48 }
 0x127   :  { %2956 = vpow2.f32 %v1989_v51 }
 0x130   :  { %v2955_v52 = vpop.eup %2954 }
 0x131   :  { %v510_v53 = vadd.f32 1.0, %v2955_v52  ;;  %v2957_v54 = vpop.eup %2956 }
 0x132   :  { %v517_v57 = vadd.f32 1.0, %v2957_v54 }
 0x133   :  { %2958 = vrcp.f32 %v510_v53 }
 0x134   :  { %2960 = vrcp.f32 %v517_v57 }
 0x13d   :  { %v2959_v58 = vpop.eup %2958 }
 0x13e   :  { %v2961_v5 = vpop.eup %2960 }
 0x13f   :  { %v523_v6 = vsub.f32 1.0, %v2961_v5  ;;  %v525_v14 = vmul.f32 %v2961_v5, %v3416_v62 }
 0x141   :  { %v502_v60 = vpop.f32.mrb[10].mxu1 }
 0x142   :  { %v520_v61 = vmul.f32 %v2959_v58, %v502_v60  ;;  %v2197_v2 = vpop.f32.mrb[11].mxu1 }
 0x144   :  { %v521_v3 = vadd.f32 %v520_v61, %v277_v31 }
 0x146   :  { %2962 = vtanh.f32 %v521_v3 }
 0x150   :  { %v2963_v9 = vpop.eup %2962 }
 0x151   :  { %v524_v10 = vmul.f32 %v2963_v9, %v523_v6 }
 0x153   :  { %v3510_v15 = vadd.f32 %v525_v14, %v524_v10 }
 0x155   :  { %592 = vmatmul.mubr.f32.vlgmr.msra.gmra.mrb[2].mxu0 %v3510_v15  ;;  %2231 = vmatmul.mubr.f32.vlgmr.msra.gmra.mrb[12].mxu1 %v3510_v15 }
 0x156   :  { %2558 = vmatpush1.bf16.msra.mxu0 %v3300_v11  ;;  %2589 = vmatpush3.bf16.msra.mxu1 %v3418_v63 }
 0x157   :  { %2560 = vmatprep.subr.bf16.mxu0 %v3302_v12  ;;  %2590 = vmatprep.subr.bf16.mxu1 %v3207_v1 }
 0x158   :  { %753 = vmatprep.mubr.f32.mxu0 %v3206_v0  ;;  %2265 = vmatprep.mubr.msk.f32.mxu1 %vm3208_vm2, %v3206_v0 }
 0x15a   :  { %2562 = vmatpush1.bf16.msra.mxu0 %v3306_v17  ;;  %2592 = vmatpush3.bf16.msra.mxu1 %v3428_v4 }
 0x15b   :  { %2564 = vmatprep.subr.bf16.mxu0 %v3309_v18  ;;  %2593 = vmatprep.subr.bf16.mxu1 %v3207_v1 }
 0x15e   :  { %2566 = vmatpush1.bf16.msra.mxu0 %v3324_v25  ;;  %2595 = vmatpush3.bf16.msra.mxu1 %v3439_v8 }
 0x15f   :  { %2568 = vmatprep.subr.bf16.mxu0 %v3332_v27  ;;  %2596 = vmatprep.subr.bf16.mxu1 %v3207_v1 }
 0x162   :  { %2570 = vmatpush1.bf16.msra.mxu0 %v3349_v34  ;;  %2598 = vmatpush3.bf16.msra.mxu1 %v3448_v13 }
 0x163   :  { %2572 = vmatprep.subr.bf16.mxu0 %v3355_v36  ;;  %2599 = vmatprep.subr.bf16.mxu1 %v3207_v1 }
 0x166   :  { %2574 = vmatpush1.bf16.msra.mxu0 %v3368_v43  ;;  %2601 = vmatpush3.bf16.msra.mxu1 %v3457_v16 }
 0x167   :  { %2576 = vmatprep.subr.bf16.mxu0 %v3372_v44  ;;  %2602 = vmatprep.subr.bf16.mxu1 %v3207_v1 }
 0x16a   :  { %2578 = vmatpush1.bf16.msra.mxu0 %v3382_v49  ;;  %2604 = vmatpush3.bf16.msra.mxu1 %v3463_v21 }
 0x16b   :  { %2580 = vmatprep.subr.bf16.mxu0 %v3386_v50  ;;  %2605 = vmatprep.subr.bf16.mxu1 %v3207_v1 }
 0x16e   :  { %2582 = vmatpush1.bf16.msra.mxu0 %v3393_v55  ;;  %2607 = vmatpush3.bf16.msra.mxu1 %v3467_v24 }
 0x16f   :  { %2584 = vmatprep.subr.bf16.mxu0 %v3397_v56  ;;  %2608 = vmatprep.subr.bf16.mxu1 %v3207_v1 }
 0x172   :  { %2586 = vmatpush1.bf16.msra.mxu0 %v3404_v59  ;;  %2610 = vmatpush3.bf16.msra.mxu1 %v3471_v29 }
 0x173   :  { %2612 = vmatprep.subr.bf16.mxu0 %v3296_v7  ;;  %2643 = vmatprep.subr.bf16.mxu1 %v3207_v1 }
 0x228   :  { %v593_v62 = vpop.f32.mrb[2].mxu0  ;;  %v664_v19 = vpop.f32.mrb[12].mxu1 }
 0x229   :  { %v1990_v20 = vmul.f32 -1.442695, %v593_v62  ;;  %v595_v22 = vpop.f32.mrb[3].mxu0  ;;  %v2232_v23 = vpop.f32.mrb[13].mxu1 }
 0x22a   :  { %v1991_v26 = vmul.f32 -1.442695, %v595_v22 }
 0x22b   :  { %2964 = vpow2.f32 %v1990_v20 }
 0x22c   :  { %2966 = vpow2.f32 %v1991_v26 }
 0x235   :  { %v2965_v28 = vpop.eup %2964 }
 0x236   :  { %v672_v31 = vadd.f32 1.0, %v2965_v28  ;;  %v2967_v40 = vpop.eup %2966 }
 0x237   :  { %v679_v41 = vadd.f32 1.0, %v2967_v40 }
 0x238   :  { %2968 = vrcp.f32 %v672_v31 }
 0x239   :  { %2970 = vrcp.f32 %v679_v41 }
 0x242   :  { %v2969_v42 = vpop.eup %2968 }
 0x243   :  { %v682_v45 = vmul.f32 %v2969_v42, %v664_v19  ;;  %v2971_v47 = vpop.eup %2970 }
 0x244   :  { %v685_v48 = vsub.f32 1.0, %v2971_v47  ;;  %v687_v53 = vmul.f32 %v2971_v47, %v3510_v15 }
 0x245   :  { %v683_v46 = vadd.f32 %v3495_v30, %v682_v45 }
 0x247   :  { %2972 = vtanh.f32 %v683_v46 }
 0x251   :  { %v2973_v51 = vpop.eup %2972 }
 0x252   :  { %v686_v52 = vmul.f32 %v2973_v51, %v685_v48 }
 0x254   :  { %v3551_v54 = vadd.f32 %v687_v53, %v686_v52 }
 0x256   :  { %754 = vmatmul.mubr.f32.vlgmr.msra.gmra.mrb[4].mxu0 %v3551_v54  ;;  %2266 = vmatmul.mubr.f32.vlgmr.msra.gmra.mrb[14].mxu1 %v3551_v54 }
 0x257   :  { %2614 = vmatpush1.bf16.msra.mxu0 %v3300_v11  ;;  %2645 = vmatpush3.bf16.msra.mxu1 %v3418_v63 }
 0x258   :  { %2616 = vmatprep.subr.bf16.mxu0 %v3302_v12  ;;  %2646 = vmatprep.subr.bf16.mxu1 %v3207_v1 }
 0x259   :  { %915 = vmatprep.mubr.f32.mxu0 %v3206_v0  ;;  %2300 = vmatprep.mubr.msk.f32.mxu1 %vm3208_vm2, %v3206_v0 }
 0x25b   :  { %2618 = vmatpush1.bf16.msra.mxu0 %v3306_v17  ;;  %2648 = vmatpush3.bf16.msra.mxu1 %v3428_v4 }
 0x25c   :  { %2620 = vmatprep.subr.bf16.mxu0 %v3309_v18  ;;  %2649 = vmatprep.subr.bf16.mxu1 %v3207_v1 }
 0x25f   :  { %2622 = vmatpush1.bf16.msra.mxu0 %v3324_v25  ;;  %2651 = vmatpush3.bf16.msra.mxu1 %v3439_v8 }
 0x260   :  { %2624 = vmatprep.subr.bf16.mxu0 %v3332_v27  ;;  %2652 = vmatprep.subr.bf16.mxu1 %v3207_v1 }
 0x263   :  { %2626 = vmatpush1.bf16.msra.mxu0 %v3349_v34  ;;  %2654 = vmatpush3.bf16.msra.mxu1 %v3448_v13 }
 0x264   :  { %2628 = vmatprep.subr.bf16.mxu0 %v3355_v36  ;;  %2655 = vmatprep.subr.bf16.mxu1 %v3207_v1 }
 0x267   :  { %2630 = vmatpush1.bf16.msra.mxu0 %v3368_v43  ;;  %2657 = vmatpush3.bf16.msra.mxu1 %v3457_v16 }
 0x268   :  { %2632 = vmatprep.subr.bf16.mxu0 %v3372_v44  ;;  %2658 = vmatprep.subr.bf16.mxu1 %v3207_v1 }
 0x26b   :  { %2634 = vmatpush1.bf16.msra.mxu0 %v3382_v49  ;;  %2660 = vmatpush3.bf16.msra.mxu1 %v3463_v21 }
 0x26c   :  { %2636 = vmatprep.subr.bf16.mxu0 %v3386_v50  ;;  %2661 = vmatprep.subr.bf16.mxu1 %v3207_v1 }
 0x26f   :  { %2638 = vmatpush1.bf16.msra.mxu0 %v3393_v55  ;;  %2663 = vmatpush3.bf16.msra.mxu1 %v3467_v24 }
 0x270   :  { %2640 = vmatprep.subr.bf16.mxu0 %v3397_v56  ;;  %2664 = vmatprep.subr.bf16.mxu1 %v3207_v1 }
 0x273   :  { %2642 = vmatpush1.bf16.msra.mxu0 %v3404_v59  ;;  %2666 = vmatpush3.bf16.msra.mxu1 %v3471_v29 }
 0x274   :  { %2668 = vmatprep.subr.bf16.mxu0 %v3296_v7  ;;  %2699 = vmatprep.subr.bf16.mxu1 %v3207_v1 }
 0x329   :  { %v755_v30 = vpop.f32.mrb[4].mxu0  ;;  %v826_v57 = vpop.f32.mrb[14].mxu1 }
 0x32a   :  { %v1992_v58 = vmul.f32 -1.442695, %v755_v30  ;;  %v757_v60 = vpop.f32.mrb[5].mxu0  ;;  %v2267_v61 = vpop.f32.mrb[15].mxu1 }
 0x32b   :  { %v1993_v2 = vmul.f32 -1.442695, %v757_v60 }
 0x32c   :  { %2974 = vpow2.f32 %v1992_v58 }
 0x32d   :  { %2976 = vpow2.f32 %v1993_v2 }
 0x336   :  { %v2975_v3 = vpop.eup %2974 }
 0x337   :  { %v834_v5 = vadd.f32 1.0, %v2975_v3  ;;  %v2977_v6 = vpop.eup %2976 }
 0x338   :  { %v841_v9 = vadd.f32 1.0, %v2977_v6 }
 0x339   :  { %2978 = vrcp.f32 %v834_v5 }
 0x33a   :  { %2980 = vrcp.f32 %v841_v9 }
 0x343   :  { %v2979_v10 = vpop.eup %2978 }
 0x344   :  { %v844_v14 = vmul.f32 %v2979_v10, %v826_v57  ;;  %v2981_v19 = vpop.eup %2980 }
 0x345   :  { %v847_v20 = vsub.f32 1.0, %v2981_v19  ;;  %v849_v26 = vmul.f32 %v2981_v19, %v3551_v54 }
 0x346   :  { %v845_v62 = vadd.f32 %v844_v14, %v3499_v33 }
 0x348   :  { %2982 = vtanh.f32 %v845_v62 }
 0x352   :  { %v2983_v22 = vpop.eup %2982 }
 0x353   :  { %v848_v23 = vmul.f32 %v2983_v22, %v847_v20 }
 0x355   :  { %v3592_v28 = vadd.f32 %v849_v26, %v848_v23 }
 0x357   :  { %916 = vmatmul.mubr.f32.vlgmr.msra.gmra.mrb[6].mxu0 %v3592_v28  ;;  %2301 = vmatmul.mubr.f32.vlgmr.msra.gmra.mrb[16].mxu1 %v3592_v28 }
 0x358   :  { %2670 = vmatpush1.bf16.msra.mxu0 %v3300_v11  ;;  %2701 = vmatpush3.bf16.msra.mxu1 %v3418_v63 }
 0x359   :  { %2672 = vmatprep.subr.bf16.mxu0 %v3302_v12  ;;  %2702 = vmatprep.subr.bf16.mxu1 %v3207_v1 }
 0x35a   :  { %1077 = vmatprep.mubr.f32.mxu0 %v3206_v0  ;;  %2335 = vmatprep.mubr.msk.f32.mxu1 %vm3208_vm2, %v3206_v0 }
 0x35c   :  { %2674 = vmatpush1.bf16.msra.mxu0 %v3306_v17  ;;  %2704 = vmatpush3.bf16.msra.mxu1 %v3428_v4 }
 0x35d   :  { %2676 = vmatprep.subr.bf16.mxu0 %v3309_v18  ;;  %2705 = vmatprep.subr.bf16.mxu1 %v3207_v1 }
 0x360   :  { %2678 = vmatpush1.bf16.msra.mxu0 %v3324_v25  ;;  %2707 = vmatpush3.bf16.msra.mxu1 %v3439_v8 }
 0x361   :  { %2680 = vmatprep.subr.bf16.mxu0 %v3332_v27  ;;  %2708 = vmatprep.subr.bf16.mxu1 %v3207_v1 }
 0x364   :  { %2682 = vmatpush1.bf16.msra.mxu0 %v3349_v34  ;;  %2710 = vmatpush3.bf16.msra.mxu1 %v3448_v13 }
 0x365   :  { %2684 = vmatprep.subr.bf16.mxu0 %v3355_v36  ;;  %2711 = vmatprep.subr.bf16.mxu1 %v3207_v1 }
 0x368   :  { %2686 = vmatpush1.bf16.msra.mxu0 %v3368_v43  ;;  %2713 = vmatpush3.bf16.msra.mxu1 %v3457_v16 }
 0x369   :  { %2688 = vmatprep.subr.bf16.mxu0 %v3372_v44  ;;  %2714 = vmatprep.subr.bf16.mxu1 %v3207_v1 }
 0x36c   :  { %2690 = vmatpush1.bf16.msra.mxu0 %v3382_v49  ;;  %2716 = vmatpush3.bf16.msra.mxu1 %v3463_v21 }
 0x36d   :  { %2692 = vmatprep.subr.bf16.mxu0 %v3386_v50  ;;  %2717 = vmatprep.subr.bf16.mxu1 %v3207_v1 }
 0x370   :  { %2694 = vmatpush1.bf16.msra.mxu0 %v3393_v55  ;;  %2719 = vmatpush3.bf16.msra.mxu1 %v3467_v24 }
 0x371   :  { %2696 = vmatprep.subr.bf16.mxu0 %v3397_v56  ;;  %2720 = vmatprep.subr.bf16.mxu1 %v3207_v1 }
 0x374   :  { %2698 = vmatpush1.bf16.msra.mxu0 %v3404_v59  ;;  %2722 = vmatpush3.bf16.msra.mxu1 %v3471_v29 }
 0x375   :  { %2724 = vmatprep.subr.bf16.mxu0 %v3296_v7  ;;  %2755 = vmatprep.subr.bf16.mxu1 %v3207_v1 }
 0x42a   :  { %v917_v33 = vpop.f32.mrb[6].mxu0  ;;  %v988_v31 = vpop.f32.mrb[16].mxu1 }
 0x42b   :  { %v1994_v40 = vmul.f32 -1.442695, %v917_v33  ;;  %v919_v41 = vpop.f32.mrb[7].mxu0  ;;  %v2302_v42 = vpop.f32.mrb[17].mxu1 }
 0x42c   :  { %v1995_v45 = vmul.f32 -1.442695, %v919_v41 }
 0x42d   :  { %2984 = vpow2.f32 %v1994_v40 }
 0x42e   :  { %2986 = vpow2.f32 %v1995_v45 }
 0x437   :  { %v2985_v46 = vpop.eup %2984 }
 0x438   :  { %v996_v47 = vadd.f32 1.0, %v2985_v46  ;;  %v2987_v48 = vpop.eup %2986 }
 0x439   :  { %v1003_v51 = vadd.f32 1.0, %v2987_v48 }
 0x43a   :  { %2988 = vrcp.f32 %v996_v47 }
 0x43b   :  { %2990 = vrcp.f32 %v1003_v51 }
 0x444   :  { %v2989_v52 = vpop.eup %2988 }
 0x445   :  { %v1006_v53 = vmul.f32 %v2989_v52, %v988_v31  ;;  %v2991_v57 = vpop.eup %2990 }
 0x446   :  { %v1009_v58 = vsub.f32 1.0, %v2991_v57  ;;  %v1011_v2 = vmul.f32 %v2991_v57, %v3592_v28 }
 0x447   :  { %v1007_v30 = vadd.f32 %v3497_v32, %v1006_v53 }
 0x449   :  { %2992 = vtanh.f32 %v1007_v30 }
 0x453   :  { %v2993_v60 = vpop.eup %2992 }
 0x454   :  { %v1010_v61 = vmul.f32 %v2993_v60, %v1009_v58 }
 0x456   :  { %v3633_v3 = vadd.f32 %v1011_v2, %v1010_v61 }
 0x458   :  { %1078 = vmatmul.mubr.f32.vlgmr.msra.gmra.mrb[8].mxu0 %v3633_v3  ;;  %2336 = vmatmul.mubr.f32.vlgmr.msra.gmra.mrb[18].mxu1 %v3633_v3 }
 0x459   :  { %2726 = vmatpush1.bf16.msra.mxu0 %v3300_v11  ;;  %2757 = vmatpush3.bf16.msra.mxu1 %v3418_v63 }
 0x45a   :  { %2728 = vmatprep.subr.bf16.mxu0 %v3302_v12  ;;  %2758 = vmatprep.subr.bf16.mxu1 %v3207_v1 }
 0x45b   :  { %1239 = vmatprep.mubr.f32.mxu0 %v3206_v0  ;;  %2370 = vmatprep.mubr.msk.f32.mxu1 %vm3208_vm2, %v3206_v0 }
 0x45d   :  { %2730 = vmatpush1.bf16.msra.mxu0 %v3306_v17  ;;  %2760 = vmatpush3.bf16.msra.mxu1 %v3428_v4 }
 0x45e   :  { %2732 = vmatprep.subr.bf16.mxu0 %v3309_v18  ;;  %2761 = vmatprep.subr.bf16.mxu1 %v3207_v1 }
 0x461   :  { %2734 = vmatpush1.bf16.msra.mxu0 %v3324_v25  ;;  %2763 = vmatpush3.bf16.msra.mxu1 %v3439_v8 }
 0x462   :  { %2736 = vmatprep.subr.bf16.mxu0 %v3332_v27  ;;  %2764 = vmatprep.subr.bf16.mxu1 %v3207_v1 }
 0x465   :  { %2738 = vmatpush1.bf16.msra.mxu0 %v3349_v34  ;;  %2766 = vmatpush3.bf16.msra.mxu1 %v3448_v13 }
 0x466   :  { %2740 = vmatprep.subr.bf16.mxu0 %v3355_v36  ;;  %2767 = vmatprep.subr.bf16.mxu1 %v3207_v1 }
 0x469   :  { %2742 = vmatpush1.bf16.msra.mxu0 %v3368_v43  ;;  %2769 = vmatpush3.bf16.msra.mxu1 %v3457_v16 }
 0x46a   :  { %2744 = vmatprep.subr.bf16.mxu0 %v3372_v44  ;;  %2770 = vmatprep.subr.bf16.mxu1 %v3207_v1 }
 0x46d   :  { %2746 = vmatpush1.bf16.msra.mxu0 %v3382_v49  ;;  %2772 = vmatpush3.bf16.msra.mxu1 %v3463_v21 }
 0x46e   :  { %2748 = vmatprep.subr.bf16.mxu0 %v3386_v50  ;;  %2773 = vmatprep.subr.bf16.mxu1 %v3207_v1 }
 0x471   :  { %2750 = vmatpush1.bf16.msra.mxu0 %v3393_v55  ;;  %2775 = vmatpush3.bf16.msra.mxu1 %v3467_v24 }
 0x472   :  { %2752 = vmatprep.subr.bf16.mxu0 %v3397_v56  ;;  %2776 = vmatprep.subr.bf16.mxu1 %v3207_v1 }
 0x475   :  { %2754 = vmatpush1.bf16.msra.mxu0 %v3404_v59  ;;  %2778 = vmatpush3.bf16.msra.mxu1 %v3471_v29 }
 0x476   :  { %2780 = vmatprep.subr.bf16.mxu0 %v3296_v7  ;;  %2811 = vmatprep.subr.bf16.mxu1 %v3207_v1 }
 0x52b   :  { %v1079_v32 = vpop.f32.mrb[8].mxu0  ;;  %v1150_v5 = vpop.f32.mrb[18].mxu1 }
 0x52c   :  { %v1996_v6 = vmul.f32 -1.442695, %v1079_v32  ;;  %v1081_v9 = vpop.f32.mrb[9].mxu0  ;;  %v2337_v10 = vpop.f32.mrb[19].mxu1 }
 0x52d   :  { %v1997_v14 = vmul.f32 -1.442695, %v1081_v9 }
 0x52e   :  { %2994 = vpow2.f32 %v1996_v6 }
 0x52f   :  { %2996 = vpow2.f32 %v1997_v14 }
 0x538   :  { %v2995_v62 = vpop.eup %2994 }
 0x539   :  { %v1158_v19 = vadd.f32 1.0, %v2995_v62  ;;  %v2997_v20 = vpop.eup %2996 }
 0x53a   :  { %v1165_v22 = vadd.f32 1.0, %v2997_v20 }
 0x53b   :  { %2998 = vrcp.f32 %v1158_v19 }
 0x53c   :  { %3000 = vrcp.f32 %v1165_v22  ;;  %v1666_v22 = vld [vmem:[#allocation5 + $0x20] sm:$0xff] }
 0x545   :  { %v2999_v23 = vpop.eup %2998 }
 0x546   :  { %v1168_v26 = vmul.f32 %v2999_v23, %v1150_v5  ;;  %v3001_v31 = vpop.eup %3000  ;;  %v1668_v23 = vld [vmem:[#allocation5 + $0x30] sm:$0xff] }
 0x547   :  { %v1171_v40 = vsub.f32 1.0, %v3001_v31  ;;  %v1173_v45 = vmul.f32 %v3001_v31, %v3633_v3 }
 0x548   :  { %v1169_v33 = vadd.f32 %v1168_v26, %v3503_v37  ;;  %v1671_v26 = vld [vmem:[#allocation5 + $0x48] sm:$0xff] }
 0x54a   :  { %3002 = vtanh.f32 %v1169_v33  ;;  %v1673_v33 = vld [vmem:[#allocation5 + $0x58] sm:$0xff] }
 0x54b   :  { %v2899_v31 = vpack.c.bf16 %v1673_v33, %v1671_v26 }
 0x554   :  { %v3003_v41 = vpop.eup %3002 }
 0x555   :  { %v1172_v42 = vmul.f32 %v3003_v41, %v1171_v40  ;;  %v1670_v40 = vld [vmem:[#allocation5 + $0x40] sm:$0xff]  ;;  %v1672_v41 = vld [vmem:[#allocation5 + $0x50] sm:$0xff] }
 0x557   :  { %v3674_v46 = vadd.f32 %v1173_v45, %v1172_v42  ;;  %v1675_v42 = vld [vmem:[#allocation5 + $0x68] sm:$0xff]  ;;  %v1677_v45 = vld [vmem:[#allocation5 + $0x78] sm:$0xff] }
 0x559   :  { %1240 = vmatmul.mubr.f32.vlgmr.msra.gmra.mrb[10].mxu0 %v3674_v46  ;;  %2371 = vmatmul.mubr.f32.vlgmr.msra.gmra.mrb[20].mxu1 %v3674_v46 }
 0x55a   :  { %2782 = vmatpush1.bf16.msra.mxu0 %v3300_v11  ;;  %2813 = vmatpush3.bf16.msra.mxu1 %v3418_v63 }
 0x55b   :  { %2784 = vmatprep.subr.bf16.mxu0 %v3302_v12  ;;  %2814 = vmatprep.subr.bf16.mxu1 %v3207_v1 }
 0x55c   :  { %1401 = vmatprep.mubr.f32.mxu0 %v3206_v0  ;;  %2405 = vmatprep.mubr.msk.f32.mxu1 %vm3208_vm2, %v3206_v0 }
 0x55e   :  { %2786 = vmatpush1.bf16.msra.mxu0 %v3306_v17  ;;  %2816 = vmatpush3.bf16.msra.mxu1 %v3428_v4 }
 0x55f   :  { %2788 = vmatprep.subr.bf16.mxu0 %v3309_v18  ;;  %2817 = vmatprep.subr.bf16.mxu1 %v3207_v1 }
 0x562   :  { %2790 = vmatpush1.bf16.msra.mxu0 %v3324_v25  ;;  %2819 = vmatpush3.bf16.msra.mxu1 %v3439_v8 }
 0x563   :  { %2792 = vmatprep.subr.bf16.mxu0 %v3332_v27  ;;  %2820 = vmatprep.subr.bf16.mxu1 %v3207_v1 }
 0x566   :  { %2794 = vmatpush1.bf16.msra.mxu0 %v3349_v34  ;;  %2822 = vmatpush3.bf16.msra.mxu1 %v3448_v13 }
 0x567   :  { %2796 = vmatprep.subr.bf16.mxu0 %v3355_v36  ;;  %2823 = vmatprep.subr.bf16.mxu1 %v3207_v1 }
 0x56a   :  { %2798 = vmatpush1.bf16.msra.mxu0 %v3368_v43  ;;  %2825 = vmatpush3.bf16.msra.mxu1 %v3457_v16 }
 0x56b   :  { %2800 = vmatprep.subr.bf16.mxu0 %v3372_v44  ;;  %2826 = vmatprep.subr.bf16.mxu1 %v3207_v1 }
 0x56e   :  { %2802 = vmatpush1.bf16.msra.mxu0 %v3382_v49  ;;  %2828 = vmatpush3.bf16.msra.mxu1 %v3463_v21 }
 0x56f   :  { %2804 = vmatprep.subr.bf16.mxu0 %v3386_v50  ;;  %2829 = vmatprep.subr.bf16.mxu1 %v3207_v1 }
 0x572   :  { %2806 = vmatpush1.bf16.msra.mxu0 %v3393_v55  ;;  %2831 = vmatpush3.bf16.msra.mxu1 %v3467_v24 }
 0x573   :  { %2808 = vmatprep.subr.bf16.mxu0 %v3397_v56  ;;  %2832 = vmatprep.subr.bf16.mxu1 %v3207_v1 }
 0x576   :  { %2810 = vmatpush1.bf16.msra.mxu0 %v3404_v59  ;;  %2834 = vmatpush3.bf16.msra.mxu1 %v3471_v29 }
 0x577   :  { %2836 = vmatprep.subr.bf16.mxu0 %v3296_v7  ;;  %2867 = vmatprep.subr.bf16.mxu1 %v3207_v1 }
 0x62c   :  { %v1241_v37 = vpop.f32.mrb[10].mxu0  ;;  %v1312_v47 = vpop.f32.mrb[20].mxu1 }
 0x62d   :  { %v1998_v48 = vmul.f32 -1.442695, %v1241_v37  ;;  %v1243_v51 = vpop.f32.mrb[11].mxu0  ;;  %v2372_v52 = vpop.f32.mrb[21].mxu1  ;;  %v2901_v37 = vpack.c.bf16 %v1672_v41, %v1670_v40 }
 0x62e   :  { %v1999_v53 = vmul.f32 -1.442695, %v1243_v51  ;;  %v1676_v51 = vld [vmem:[#allocation5 + $0x70] sm:$0xff]  ;;  %v1679_v52 = vld [vmem:[#allocation5 + $0x88] sm:$0xff] }
 0x62f   :  { %3004 = vpow2.f32 %v1998_v48  ;;  %v1674_v48 = vld [vmem:[#allocation5 + $0x60] sm:$0xff] }
 0x630   :  { %3006 = vpow2.f32 %v1999_v53  ;;  %v1681_v53 = vld [vmem:[#allocation5 + $0x98] sm:$0xff] }
 0x639   :  { %v3005_v30 = vpop.eup %3004 }
 0x63a   :  { %v1320_v57 = vadd.f32 1.0, %v3005_v30  ;;  %v3007_v58 = vpop.eup %3006  ;;  %v2905_v30 = vpack.c.bf16 %v1676_v51, %v1674_v48 }
 0x63b   :  { %v1327_v60 = vadd.f32 1.0, %v3007_v58  ;;  %v1678_v58 = vld [vmem:[#allocation5 + $0x80] sm:$0xff] }
 0x63c   :  { %3008 = vrcp.f32 %v1320_v57  ;;  %v2907_v57 = vpack.c.bf16 %v1681_v53, %v1679_v52 }
 0x63d   :  { %3010 = vrcp.f32 %v1327_v60  ;;  %v1680_v60 = vld [vmem:[#allocation5 + $0x90] sm:$0xff] }
 0x646   :  { %v3009_v61 = vpop.eup %3008 }
 0x647   :  { %v1330_v2 = vmul.f32 %v3009_v61, %v1312_v47  ;;  %v3011_v32 = vpop.eup %3010  ;;  %v2903_v47 = vpack.c.bf16 %v1677_v45, %v1675_v42  ;;  %v1683_v61 = vld [vmem:[#allocation5 + $0xa8] sm:$0xff] }
 0x648   :  { %v1333_v5 = vsub.f32 1.0, %v3011_v32  ;;  %v1335_v10 = vmul.f32 %v3011_v32, %v3674_v46 }
 0x649   :  { %v1331_v7 = vadd.f32 %v3501_v35, %v1330_v2  ;;  %v1685_v2 = vld [vmem:[#allocation5 + $0xb8] sm:$0xff] }
 0x64a   :  { %v2911_v32 = vpack.c.bf16 %v1685_v2, %v1683_v61 }
 0x64b   :  { %3012 = vtanh.f32 %v1331_v7  ;;  %v2909_v7 = vpack.c.bf16 %v1680_v60, %v1678_v58 }
 0x655   :  { %v3013_v6 = vpop.eup %3012 }
 0x656   :  { %v1334_v9 = vmul.f32 %v3013_v6, %v1333_v5  ;;  %v1682_v5 = vld [vmem:[#allocation5 + $0xa0] sm:$0xff]  ;;  %v1684_v6 = vld [vmem:[#allocation5 + $0xb0] sm:$0xff] }
 0x658   :  { %v3715_v14 = vadd.f32 %v1335_v10, %v1334_v9  ;;  %v1687_v9 = vld [vmem:[#allocation5 + $0xc8] sm:$0xff]  ;;  %v1689_v10 = vld [vmem:[#allocation5 + $0xd8] sm:$0xff] }
 0x65a   :  { %1402 = vmatmul.mubr.f32.vlgmr.msra.gmra.mrb[12].mxu0 %v3715_v14  ;;  %2406 = vmatmul.mubr.f32.vlgmr.msra.gmra.mrb[22].mxu1 %v3715_v14 }
 0x65b   :  { %2838 = vmatpush1.bf16.msra.mxu0 %v3300_v11  ;;  %2869 = vmatpush3.bf16.msra.mxu1 %v3418_v63  ;;  %v1663_v11 = vld [vmem:[#allocation5 + $0x8] sm:$0xff] }
 0x65c   :  { %2840 = vmatprep.subr.bf16.mxu0 %v3302_v12  ;;  %2870 = vmatprep.subr.bf16.mxu1 %v3207_v1  ;;  %v1665_v12 = vld [vmem:[#allocation5 + $0x18] sm:$0xff] }
 0x65d   :  { %1563 = vmatprep.mubr.f32.mxu0 %v3206_v0  ;;  %2440 = vmatprep.mubr.msk.f32.mxu1 %vm3208_vm2, %v3206_v0 }
 0x65f   :  { %2842 = vmatpush1.bf16.msra.mxu0 %v3306_v17  ;;  %2872 = vmatpush3.bf16.msra.mxu1 %v3428_v4  ;;  %v2891_v17 = vpack.c.bf16 %v1665_v12, %v1663_v11  ;;  %v2913_v11 = vpack.c.bf16 %v1684_v6, %v1682_v5  ;;  %v2915_v12 = vpack.c.bf16 %v1689_v10, %v1687_v9 }
 0x660   :  { %2844 = vmatprep.subr.bf16.mxu0 %v3309_v18  ;;  %2873 = vmatprep.subr.bf16.mxu1 %v3207_v1 }
 0x663   :  { %2846 = vmatpush1.bf16.msra.mxu0 %v3324_v25  ;;  %2875 = vmatpush3.bf16.msra.mxu1 %v3439_v8  ;;  %v1662_v8 = vld [vmem:[#allocation5] sm:$0xff] }
 0x664   :  { %2848 = vmatprep.subr.bf16.mxu0 %v3332_v27  ;;  %2876 = vmatprep.subr.bf16.mxu1 %v3207_v1 }
 0x667   :  { %2850 = vmatpush1.bf16.msra.mxu0 %v3349_v34  ;;  %2878 = vmatpush3.bf16.msra.mxu1 %v3448_v13  ;;  %v1664_v13 = vld [vmem:[#allocation5 + $0x10] sm:$0xff] }
 0x668   :  { %2852 = vmatprep.subr.bf16.mxu0 %v3355_v36  ;;  %2879 = vmatprep.subr.bf16.mxu1 %v3207_v1  ;;  %v2893_v62 = vpack.c.bf16 %v1664_v13, %v1662_v8 }
 0x66b   :  { %2854 = vmatpush1.bf16.msra.mxu0 %v3368_v43  ;;  %2881 = vmatpush3.bf16.msra.mxu1 %v3457_v16 }
 0x66c   :  { %2856 = vmatprep.subr.bf16.mxu0 %v3372_v44  ;;  %2882 = vmatprep.subr.bf16.mxu1 %v3207_v1 }
 0x66f   :  { %2858 = vmatpush1.bf16.msra.mxu0 %v3382_v49  ;;  %2884 = vmatpush3.bf16.msra.mxu1 %v3463_v21  ;;  %v1667_v21 = vld [vmem:[#allocation5 + $0x28] sm:$0xff] }
 0x670   :  { %2860 = vmatprep.subr.bf16.mxu0 %v3386_v50  ;;  %2885 = vmatprep.subr.bf16.mxu1 %v3207_v1 }
 0x673   :  { %2862 = vmatpush1.bf16.msra.mxu0 %v3393_v55  ;;  %2887 = vmatpush3.bf16.msra.mxu1 %v3467_v24  ;;  %v1669_v24 = vld [vmem:[#allocation5 + $0x38] sm:$0xff] }
 0x674   :  { %2864 = vmatprep.subr.bf16.mxu0 %v3397_v56  ;;  %2888 = vmatprep.subr.bf16.mxu1 %v3207_v1  ;;  %v2895_v20 = vpack.c.bf16 %v1669_v24, %v1667_v21 }
 0x677   :  { %2866 = vmatpush1.bf16.msra.mxu0 %v3404_v59  ;;  %2890 = vmatpush3.bf16.msra.mxu1 %v3471_v29 }
 0x678   :  { %2892 = vmatprep.subr.bf16.mxu0 %v2891_v17  ;;  %v1686_v17 = vld [vmem:[#allocation5 + $0xc0] sm:$0xff] }
 0x72d   :  { %v1403_v18 = vpop.f32.mrb[12].mxu0  ;;  %v1474_v25 = vpop.f32.mrb[22].mxu1 }
 0x72e   :  { %v2000_v27 = vmul.f32 -1.442695, %v1403_v18  ;;  %v1405_v34 = vpop.f32.mrb[13].mxu0  ;;  %v2407_v36 = vpop.f32.mrb[23].mxu1  ;;  %v1688_v18 = vld [vmem:[#allocation5 + $0xd0] sm:$0xff] }
 0x72f   :  { %v2001_v43 = vmul.f32 -1.442695, %v1405_v34  ;;  %v2917_v34 = vpack.c.bf16 %v1688_v18, %v1686_v17 }
 0x730   :  { %3014 = vpow2.f32 %v2000_v27  ;;  %v1693_v27 = vld [vmem:[#allocation5 + $0xf8] sm:$0xff] }
 0x731   :  { %3016 = vpow2.f32 %v2001_v43  ;;  %v1690_v43 = vld [vmem:[#allocation5 + $0xe0] sm:$0xff] }
 0x73a   :  { %v3015_v44 = vpop.eup %3014 }
 0x73b   :  { %v1482_v49 = vadd.f32 1.0, %v3015_v44  ;;  %v3017_v50 = vpop.eup %3016  ;;  %v1692_v44 = vld [vmem:[#allocation5 + $0xf0] sm:$0xff] }
 0x73c   :  { %v1489_v55 = vadd.f32 1.0, %v3017_v50 }
 0x73d   :  { %3018 = vrcp.f32 %v1482_v49  ;;  %v2921_v49 = vpack.c.bf16 %v1692_v44, %v1690_v43 }
 0x73e   :  { %3020 = vrcp.f32 %v1489_v55 }
 0x747   :  { %v3019_v56 = vpop.eup %3018 }
 0x748   :  { %v1492_v59 = vmul.f32 %v3019_v56, %v1474_v25  ;;  %v3021_v1 = vpop.eup %3020  ;;  %v1691_v25 = vld [vmem:[#allocation5 + $0xe8] sm:$0xff] }
 0x749   :  { %v1495_v4 = vsub.f32 1.0, %v3021_v1  ;;  %v1497_v35 = vmul.f32 %v3021_v1, %v3715_v14  ;;  %v2919_v36 = vpack.c.bf16 %v1693_v27, %v1691_v25 }
 0x74a   :  { %v1493_v63 = vadd.f32 %v1492_v59, %v3507_v39  ;;  %v2897_v39 = vpack.c.bf16 %v1668_v23, %v1666_v22 }
 0x74c   :  { %3022 = vtanh.f32 %v1493_v63  ;;  %v1807_v63 = vlaneseq }
 0x756   :  { %v3023_v16 = vpop.eup %3022 }
 0x757   :  { %v1496_v29 = vmul.f32 %v3023_v16, %v1495_v4  ;;  %v3773_v4 = vand.u32 127, %v1807_v63 }
 0x759   :  { %v3754_v19 = vadd.f32 %v1497_v35, %v1496_v29  ;;  %vm1809_vm3 = vcmp.lt.s32.totalorder %v3773_v4, 8 }
 0x75b   :  { %1564 = vmatmul.mubr.f32.vlgmr.msra.gmra.mrb[14].mxu0 %v3754_v19  ;;  %2441 = vmatmul.mubr.f32.vlgmr.msra.gmra.mrb[24].mxu1 %v3754_v19 }
 0x75c   :  { %2894 = vmatpush1.bf16.msra.mxu0 %v2893_v62  ;;  %1758 = vmatprep.mubr.f32.mxu0 %v3206_v0 }
 0x75d   :  { %2896 = vmatprep.subr.bf16.mxu0 %v2895_v20 }
 0x760   :  { %2898 = vmatpush1.bf16.msra.mxu0 %v2897_v39 }
 0x761   :  { %2900 = vmatprep.subr.bf16.mxu0 %v2899_v31 }
 0x764   :  { %2902 = vmatpush1.bf16.msra.mxu0 %v2901_v37 }
 0x765   :  { %2904 = vmatprep.subr.bf16.mxu0 %v2903_v47 }
 0x768   :  { %2906 = vmatpush1.bf16.msra.mxu0 %v2905_v30 }
 0x769   :  { %2908 = vmatprep.subr.bf16.mxu0 %v2907_v57 }
 0x76c   :  { %2910 = vmatpush1.bf16.msra.mxu0 %v2909_v7 }
 0x76d   :  { %2912 = vmatprep.subr.bf16.mxu0 %v2911_v32 }
 0x770   :  { %2914 = vmatpush1.bf16.msra.mxu0 %v2913_v11 }
 0x771   :  { %2916 = vmatprep.subr.bf16.mxu0 %v2915_v12 }
 0x774   :  { %2918 = vmatpush1.bf16.msra.mxu0 %v2917_v34 }
 0x775   :  { %2920 = vmatprep.subr.bf16.mxu0 %v2919_v36 }
 0x778   :  { %2922 = vmatpush1.bf16.msra.mxu0 %v2921_v49 }
 0x77b   :  { %1759 = vmatmul.mubr.f32.vlgmr.msra.gmra.mrb[16].mxu0 %v3510_v15 }
 0x77c   :  { %1764 = vmatprep.mubr.f32.mxu0 %v3206_v0 }
 0x77f   :  { %1765 = vmatmul.mubr.f32.gmra.mrb[18].mxu0 %v3551_v54 }
 0x780   :  { %1770 = vmatprep.mubr.f32.mxu0 %v3206_v0 }
 0x783   :  { %1771 = vmatmul.mubr.f32.gmra.mrb[20].mxu0 %v3592_v28 }
 0x784   :  { %1776 = vmatprep.mubr.f32.mxu0 %v3206_v0 }
 0x787   :  { %1777 = vmatmul.mubr.f32.gmra.mrb[22].mxu0 %v3633_v3 }
 0x788   :  { %1782 = vmatprep.mubr.f32.mxu0 %v3206_v0 }
 0x78b   :  { %1783 = vmatmul.mubr.f32.gmra.mrb[24].mxu0 %v3674_v46 }
 0x78c   :  { %1788 = vmatprep.mubr.f32.mxu0 %v3206_v0 }
 0x78f   :  { %1789 = vmatmul.mubr.f32.gmra.mrb[26].mxu0 %v3715_v14 }
 0x790   :  { %1794 = vmatprep.mubr.f32.mxu0 %v3206_v0 }
 0x793   :  { %1795 = vmatmul.mubr.f32.gmra.mrb[28].mxu0 %v3754_v19 }
 0x794   :  { %1800 = vmatprep.mubr.f32.mxu0 %v3206_v0 }
 0x82e   :  { %v1565_v15 = vpop.f32.mrb[14].mxu0  ;;  %v1636_v54 = vpop.f32.mrb[24].mxu1 }
 0x82f   :  { %v2002_v28 = vmul.f32 -1.442695, %v1565_v15  ;;  %v1567_v50 = vpop.f32.mrb[15].mxu0  ;;  %v2442_v55 = vpop.f32.mrb[25].mxu1 }
 0x830   :  { %v2003_v3 = vmul.f32 -1.442695, %v1567_v50 }
 0x831   :  { %3024 = vpow2.f32 %v2002_v28 }
 0x832   :  { %3026 = vpow2.f32 %v2003_v3 }
 0x83b   :  { %v3025_v56 = vpop.eup %3024 }
 0x83c   :  { %v1644_v46 = vadd.f32 1.0, %v3025_v56  ;;  %v3027_v59 = vpop.eup %3026 }
 0x83d   :  { %v1651_v14 = vadd.f32 1.0, %v3027_v59 }
 0x83e   :  { %3028 = vrcp.f32 %v1644_v46 }
 0x83f   :  { %3030 = vrcp.f32 %v1651_v14 }
 0x848   :  { %v3029_v1 = vpop.eup %3028 }
 0x849   :  { %v1654_v8 = vmul.f32 %v3029_v1, %v1636_v54  ;;  %v3031_v35 = vpop.eup %3030 }
 0x84a   :  { %v1657_v23 = vsub.f32 1.0, %v3031_v35  ;;  %v1659_v41 = vmul.f32 %v3031_v35, %v3754_v19 }
 0x84b   :  { %v1655_v0 = vadd.f32 %v3505_v38, %v1654_v8 }
 0x84d   :  { %3032 = vtanh.f32 %v1655_v0 }
 0x84e   :  { %v1760_v13 = vpop.f32.mrb[16].mxu0 }
 0x84f   :  { %v1762_v16 = vpop.f32.mrb[17].mxu0  ;;  %v3779_v21 = vsel %vm1809_vm3, %v1760_v13, -1e+30 }
 0x850   :  { %v1898_v24 = vmul.f32 1.442695, %v1762_v16  ;;  %1818 = vmax.xlane.f32.xlu0 %v3779_v21 }
 0x852   :  { %3034 = vpow2.f32 %v1898_v24  ;;  %v1766_v29 = vpop.f32.mrb[18].mxu0 }
 0x853   :  { %v1768_v62 = vpop.f32.mrb[19].mxu0  ;;  %v3784_v20 = vsel %vm1809_vm3, %v1766_v29, -1e+30 }
 0x854   :  { %v1900_v38 = vmul.f32 1.442695, %v1768_v62  ;;  %1820 = vmax.xlane.f32.xlu0 %v3784_v20 }
 0x856   :  { %3036 = vpow2.f32 %v1900_v38  ;;  %v1772_v22 = vpop.f32.mrb[20].mxu0 }
 0x857   :  { %v3033_v26 = vpop.eup %3032  ;;  %v1774_v33 = vpop.f32.mrb[21].mxu0  ;;  %v1812_v39 = vsel %vm1809_vm3, %v1772_v22, -1e+30 }
 0x858   :  { %v1902_v31 = vmul.f32 1.442695, %v1774_v33  ;;  %1822 = vmax.xlane.f32.xlu1 %v1812_v39  ;;  %v1658_v40 = vmul.f32 %v3033_v26, %v1657_v23 }
 0x85a   :  { %3038 = vpow2.f32 %v1902_v31  ;;  %v1778_v42 = vpop.f32.mrb[22].mxu0  ;;  %v1660_v45 = vadd.f32 %v1659_v41, %v1658_v40 }
 0x85b   :  { %v1780_v37 = vpop.f32.mrb[23].mxu0  ;;  %v3792_v47 = vsel %vm1809_vm3, %v1778_v42, -1e+30 }
 0x85c   :  { %v3035_v48 = vpop.eup %3034  ;;  %v1904_v51 = vmul.f32 1.442695, %v1780_v37  ;;  %1824 = vmax.xlane.f32.xlu1 %v3792_v47  ;;  %1801 = vmatmul.mubr.f32.gmra.mrb[30].mxu0 %v1660_v45  ;;  %1661 = vst [vmem:[#allocation10] sm:$0xff] %v1660_v45 }
 0x85d   :  { %1914 = vst [vmem:[#allocation8] sm:$0xff] %v3035_v48 }
 0x85e   :  { %3040 = vpow2.f32 %v1904_v51  ;;  %v1784_v52 = vpop.f32.mrb[24].mxu0 }
 0x85f   :  { %v1786_v53 = vpop.f32.mrb[25].mxu0  ;;  %v1814_v19 = vsel %vm1809_vm3, %v1784_v52, -1e+30 }
 0x860   :  { %v3037_v30 = vpop.eup %3036  ;;  %v1906_v57 = vmul.f32 1.442695, %v1786_v53  ;;  %1826 = vmax.xlane.f32.xlu0 %v1814_v19 }
 0x861   :  { %1915 = vst [vmem:[#allocation8 + $0x8] sm:$0xff] %v3037_v30 }
 0x862   :  { %3042 = vpow2.f32 %v1906_v57  ;;  %v1790_v58 = vpop.f32.mrb[26].mxu0 }
 0x863   :  { %v1792_v60 = vpop.f32.mrb[27].mxu0  ;;  %v1815_v61 = vsel %vm1809_vm3, %v1790_v58, -1e+30 }
 0x864   :  { %v3039_v2 = vpop.eup %3038  ;;  %v1908_v7 = vmul.f32 1.442695, %v1792_v60  ;;  %1828 = vmax.xlane.f32.xlu1 %v1815_v61 }
 0x865   :  { %1916 = vst [vmem:[#allocation8 + $0x10] sm:$0xff] %v3039_v2 }
 0x866   :  { %3044 = vpow2.f32 %v1908_v7  ;;  %v1796_v32 = vpop.f32.mrb[28].mxu0 }
 0x867   :  { %v1798_v5 = vpop.f32.mrb[29].mxu0  ;;  %v1816_v6 = vsel %vm1809_vm3, %v1796_v32, -1e+30 }
 0x868   :  { %v3041_v9 = vpop.eup %3040  ;;  %v1910_v10 = vmul.f32 1.442695, %v1798_v5  ;;  %1830 = vmax.xlane.f32.xlu0 %v1816_v6 }
 0x869   :  { %1917 = vst [vmem:[#allocation8 + $0x18] sm:$0xff] %v3041_v9 }
 0x86a   :  { %3046 = vpow2.f32 %v1910_v10 }
 0x86c   :  { %v3043_v11 = vpop.eup %3042 }
 0x86d   :  { %1918 = vst [vmem:[#allocation8 + $0x20] sm:$0xff] %v3043_v11 }
 0x870   :  { %v3045_v12 = vpop.eup %3044 }
 0x871   :  { %1919 = vst [vmem:[#allocation8 + $0x28] sm:$0xff] %v3045_v12 }
 0x874   :  { %v3047_v17 = vpop.eup %3046 }
 0x875   :  { %1920 = vst [vmem:[#allocation8 + $0x30] sm:$0xff] %v3047_v17 }
 0x8dd   :  { %v1819_v18 = vpop.xlane.xlu0 %1818 }
 0x8de   :  { %v1834_v25 = vsub.f32 %v3779_v21, %v1819_v18 }
 0x8e0   :  { %v1842_v27 = vmul.f32 1.442695, %v1834_v25 }
 0x8e1   :  { %v1821_v44 = vpop.xlane.xlu0 %1820 }
 0x8e2   :  { %3048 = vpow2.f32 %v1842_v27  ;;  %v1835_v63 = vsub.f32 %v3784_v20, %v1821_v44 }
 0x8e4   :  { %v1844_v1 = vmul.f32 1.442695, %v1835_v63 }
 0x8e5   :  { %v1823_v34 = vpop.xlane.xlu1 %1822 }
 0x8e6   :  { %v1836_v36 = vsub.f32 %v1812_v39, %v1823_v34 }
 0x8e8   :  { %v1846_v43 = vmul.f32 1.442695, %v1836_v36 }
 0x8e9   :  { %v1825_v14 = vpop.xlane.xlu1 %1824 }
 0x8ea   :  { %3050 = vpow2.f32 %v1846_v43  ;;  %v1837_v8 = vsub.f32 %v3792_v47, %v1825_v14 }
 0x8ec   :  { %v3049_v49 = vpop.eup %3048  ;;  %v1848_v13 = vmul.f32 1.442695, %v1837_v8 }
 0x8ed   :  { %v1827_v15 = vpop.xlane.xlu0 %1826  ;;  %1858 = vadd.xlane.f32.xlu0 %v3049_v49 }
 0x8ee   :  { %v1838_v54 = vsub.f32 %v1814_v19, %v1827_v15 }
 0x8f0   :  { %v1850_v28 = vmul.f32 1.442695, %v1838_v54 }
 0x8f1   :  { %v1829_v0 = vpop.xlane.xlu1 %1828 }
 0x8f2   :  { %3052 = vpow2.f32 %v1850_v28  ;;  %v1839_v16 = vsub.f32 %v1815_v61, %v1829_v0 }
 0x8f4   :  { %v3051_v50 = vpop.eup %3050  ;;  %v1852_v21 = vmul.f32 1.442695, %v1839_v16 }
 0x8f5   :  { %1862 = vadd.xlane.f32.xlu0 %v3051_v50  ;;  %v1831_v55 = vpop.xlane.xlu0 %1830 }
 0x8f6   :  { %v1840_v3 = vsub.f32 %v1816_v6, %v1831_v55 }
 0x8f8   :  { %v1854_v56 = vmul.f32 1.442695, %v1840_v3 }
 0x8fa   :  { %3054 = vpow2.f32 %v1854_v56 }
 0x8fb   :  { %3056 = vpow2.f32 %v1844_v1 }
 0x8fc   :  { %v3053_v46 = vpop.eup %3052  ;;  %3058 = vpow2.f32 %v1848_v13 }
 0x8fd   :  { %1866 = vadd.xlane.f32.xlu0 %v3053_v46  ;;  %3060 = vpow2.f32 %v1852_v21 }
 0x904   :  { %v3055_v59 = vpop.eup %3054 }
 0x905   :  { %1870 = vadd.xlane.f32.xlu0 %v3055_v59  ;;  %v3057_v20 = vpop.eup %3056 }
 0x906   :  { %v3059_v38 = vpop.eup %3058 }
 0x907   :  { %v3061_v22 = vpop.eup %3060 }
 0x92f   :  { %v1802_v24 = vpop.f32.mrb[30].mxu0 }
 0x930   :  { %v1804_v29 = vpop.f32.mrb[31].mxu0  ;;  %v1817_v35 = vsel %vm1809_vm3, %v1802_v24, -1e+30 }
 0x931   :  { %v1912_v62 = vmul.f32 1.442695, %v1804_v29  ;;  %1832 = vmax.xlane.f32.xlu1 %v1817_v35 }
 0x933   :  { %3062 = vpow2.f32 %v1912_v62 }
 0x935   :  { %1860 = vadd.xlane.f32.xlu1 %v3057_v20 }
 0x939   :  { %1864 = vadd.xlane.f32.xlu1 %v3059_v38 }
 0x93d   :  { %v3063_v23 = vpop.eup %3062  ;;  %1868 = vadd.xlane.f32.xlu1 %v3061_v22 }
 0x93e   :  { %1921 = vst [vmem:[#allocation8 + $0x38] sm:$0xff] %v3063_v23 }
 0x97a   :  { %v1859_v26 = vpop.xlane.xlu0 %1858 }
 0x97b   :  { %3064 = vrcp.f32 %v1859_v26 }
 0x982   :  { %v1863_v33 = vpop.xlane.xlu0 %1862 }
 0x983   :  { %3066 = vrcp.f32 %v1863_v33 }
 0x985   :  { %v3065_v39 = vpop.eup %3064 }
 0x986   :  { %v1875_v31 = vmul.f32 %v3065_v39, %v3049_v49 }
 0x988   :  { %1890 = vst [vmem:[#allocation7] sm:$0xff] %v1875_v31 }
 0x98a   :  { %v1867_v4 = vpop.xlane.xlu0 %1866 }
 0x98b   :  { %3068 = vrcp.f32 %v1867_v4 }
 0x98d   :  { %v3067_v40 = vpop.eup %3066 }
 0x98e   :  { %v1879_v41 = vmul.f32 %v3067_v40, %v3051_v50 }
 0x990   :  { %1892 = vst [vmem:[#allocation7 + $0x10] sm:$0xff] %v1879_v41 }
 0x992   :  { %v1871_v42 = vpop.xlane.xlu0 %1870 }
 0x993   :  { %3070 = vrcp.f32 %v1871_v42 }
 0x995   :  { %v3069_v45 = vpop.eup %3068 }
 0x996   :  { %v1883_v37 = vmul.f32 %v3069_v45, %v3053_v46 }
 0x998   :  { %1894 = vst [vmem:[#allocation7 + $0x20] sm:$0xff] %v1883_v37 }
 0x99d   :  { %v3071_v47 = vpop.eup %3070 }
 0x99e   :  { %v1887_v48 = vmul.f32 %v3071_v47, %v3055_v59 }
 0x9a0   :  { %1896 = vst [vmem:[#allocation7 + $0x30] sm:$0xff] %v1887_v48 }
 0x9be   :  { %v1833_v51 = vpop.xlane.xlu1 %1832 }
 0x9bf   :  { %v1841_v52 = vsub.f32 %v1817_v35, %v1833_v51 }
 0x9c1   :  { %v1856_v53 = vmul.f32 1.442695, %v1841_v52 }
 0x9c2   :  { %v1861_v19 = vpop.xlane.xlu1 %1860 }
 0x9c3   :  { %3072 = vpow2.f32 %v1856_v53 }
 0x9c4   :  { %3074 = vrcp.f32 %v1861_v19 }
 0x9c6   :  { %v1865_v30 = vpop.xlane.xlu1 %1864 }
 0x9c7   :  { %3076 = vrcp.f32 %v1865_v30 }
 0x9ca   :  { %v1869_v57 = vpop.xlane.xlu1 %1868 }
 0x9cb   :  { %3078 = vrcp.f32 %v1869_v57 }
 0x9cd   :  { %v3073_v58 = vpop.eup %3072 }
 0x9ce   :  { %v3075_v60 = vpop.eup %3074  ;;  %1872 = vadd.xlane.f32.xlu1 %v3073_v58 }
 0x9cf   :  { %v1877_v61 = vmul.f32 %v3075_v60, %v3057_v20 }
 0x9d1   :  { %v3077_v2 = vpop.eup %3076  ;;  %1891 = vst [vmem:[#allocation7 + $0x8] sm:$0xff] %v1877_v61 }
 0x9d2   :  { %v1881_v7 = vmul.f32 %v3077_v2, %v3059_v38 }
 0x9d4   :  { %1893 = vst [vmem:[#allocation7 + $0x18] sm:$0xff] %v1881_v7 }
 0x9d5   :  { %v3079_v32 = vpop.eup %3078 }
 0x9d6   :  { %v1885_v5 = vmul.f32 %v3079_v32, %v3061_v22 }
 0x9d8   :  { %1895 = vst [vmem:[#allocation7 + $0x28] sm:$0xff] %v1885_v5 }
 0x9d9   :  { %3137 = shalt.err (!%p3134_p6)
}
 0x9da   :  { %s3138_s27 = scalar_lea.hbm %s3854_s6, 1024 }
 0x9db   :  { %p3139_p7 = scmp.ne.s32.totalorder %s3854_s6, %s3138_s27  ;;  %p3142_p8 = scmp.lt.u32.totalorder %s3138_s27, %s3854_s6 }
 0x9dd   :  { %p3144_p9 = pnand %p3142_p8, %p3139_p7 }
 0x9df   :  { %3147 = shalt.err (!%p3144_p9)
}
 0x9e0   :  { %s3210_s9 = smov 128   ;;  %s3211_s4 = smov 8  }
 0x9e1   :  { %1945 = dma.vmem_to_hbm [thread:$0]  %s1940_s24, 1024, %s3854_s6, [#allocation9], %s3210_s9, %s3210_s9, %s3211_s4  }
 0x9e2   :  { %s3212_s12 = smov [#allocation10]  }
 0x9e3   :  { %s1952_s13 = sshll.u32 %s3212_s12, 4  ;;  %s1953_s13 = int_to_ptr.vmem [resolvable:$true] %s1952_s13 }
 0x9e4   :  { %s3148_s14 = scalar_lea.vmem %s1953_s13, 128  ;;  %p3153_p11 = scmp.lt.s32.totalorder %s1953_s13, %s1953_s13 }
 0x9e5   :  { %p3149_p10 = scmp.ne.s32.totalorder %s1953_s13, %s3148_s14  ;;  %p3154_p12 = scmp.lt.s32.totalorder %s3148_s14, %s3148_s14 }
 0x9e7   :  { %p3155_p13 = por %p3154_p12, %p3153_p11 }
 0x9e9   :  { %p3156_p0 = pnand %p3155_p13, %p3149_p10 }
 0x9eb   :  { %3159 = shalt.err (!%p3156_p0)
}
 0x9ec   :  { %s3160_s17 = scalar_lea.hbm %s3855_s7, 128 }
 0x9ed   :  { %p3161_p1 = scmp.ne.s32.totalorder %s3855_s7, %s3160_s17  ;;  %p3164_p2 = scmp.lt.u32.totalorder %s3160_s17, %s3855_s7 }
 0x9ef   :  { %p3166_p3 = pnand %p3164_p2, %p3161_p1 }
 0x9f1   :  { %3169 = shalt.err (!%p3166_p3)
}
 0x9f2   :  { %1955 = dma.vmem_to_hbm [thread:$0]  %s1953_s13, 128, %s3855_s7, [#allocation9]  }
 0x9f3   :  { %s3213_s23 = smov [#allocation7]  }
 0x9f4   :  { %s1927_s0 = sshll.u32 %s3213_s23, 4  ;;  %s1928_s0 = int_to_ptr.vmem [resolvable:$true] %s1927_s0 }
 0x9f5   :  { %s3170_s2 = scalar_lea.vmem %s1928_s0, 1024  ;;  %p3175_p5 = scmp.lt.s32.totalorder %s1928_s0, %s1928_s0 }
 0x9f6   :  { %p3171_p4 = scmp.ne.s32.totalorder %s1928_s0, %s3170_s2  ;;  %p3176_p6 = scmp.lt.s32.totalorder %s3170_s2, %s3170_s2 }
 0x9f8   :  { %p3177_p7 = por %p3176_p6, %p3175_p5 }
 0x9fa   :  { %p3178_p8 = pnand %p3177_p7, %p3171_p4 }
 0xa5b   :  { %v1873_v6 = vpop.xlane.xlu1 %1872 }
 0xa5c   :  { %3080 = vrcp.f32 %v1873_v6 }
 0xa66   :  { %v3081_v9 = vpop.eup %3080 }
 0xa67   :  { %v1889_v10 = vmul.f32 %v3081_v9, %v3073_v58 }
 0xa69   :  { %1897 = vst [vmem:[#allocation7 + $0x38] sm:$0xff] %v1889_v10 }
 0xa6a   :  { %3181 = shalt.err (!%p3178_p8)
}
 0xa6b   :  { %s3182_s3 = scalar_lea.hbm %s3853_s5, 1024 }
 0xa6c   :  { %p3183_p9 = scmp.ne.s32.totalorder %s3853_s5, %s3182_s3  ;;  %p3186_p10 = scmp.lt.u32.totalorder %s3182_s3, %s3853_s5 }
 0xa6e   :  { %p3188_p11 = pnand %p3186_p10, %p3183_p9 }
 0xa70   :  { %3191 = shalt.err (!%p3188_p11)
}
 0xa71   :  { %1933 = dma.vmem_to_hbm [thread:$0]  %s1928_s0, 1024, %s3853_s5, [#allocation4], %s3210_s9, %s3210_s9, %s3211_s4  }
 0xa72   :  { %3196 = dma.done.wait [#allocation4], 1024  }
 0xa73   :  { %3197 = vsyncadd [#allocation4], 4294966272 }
 0xa74   :  { %3198 = dma.done.wait [#allocation9], 1152  }
 0xa75   :  { %3199 = vsyncadd [#allocation9], 4294966144 }
 0xa76   :  { %1965 = vsyncpa [#allocation3], 1 }
 0xa77   :  { %1966 = vsyncpa [#allocation6], 1 }
 0xa78   :  { %1967 = vsyncpa [#allocation4], 1 }
 0xa79   :  { %1968 = vsyncpa [#allocation9], 1 }

</bundles_post_ra>
